<compile_context>
chip_gen: v6e
topology: v6e:2x2x1
jax: 0.10.0
libtpu: 0.0.40
codegen_flags: <defaults>
</compile_context>

<pallas_src>
import functools

import numpy as np
import jax
import jax.numpy as jnp
from jax.experimental import pallas as pl
from jax.experimental.pallas import tpu as pltpu


def _compute_padding(size, k, s):
    # Exact mirror of CircularConv2d._compute_padding.
    if size % s == 0:
        pad = max(k - s, 0)
    else:
        pad = max(k - size % s, 0)
    pad_top = pad // 2
    return pad_top, pad - pad_top


def _circ_conv_kernel(x_ref, w_ref, b_ref, o_ref, *, kh, kw, sh, sw, oh, ow):
    # x_ref : (1, Hp, Wp, Cin)        circularly padded image for this batch
    # w_ref : (kh, kw, Cin, Cout_pad) conv weights, Cout padded to 128-multiple
    # b_ref : (1, Cout_pad)           bias (zero in the padded columns)
    # o_ref : (1, OH*OW, Cout_pad)    lane-dense flattened output
    x = x_ref[0]                                        # (Hp, Wp, Cin)
    cop = o_ref.shape[-1]
    acc = jnp.zeros((oh * ow, cop), jnp.float32)

    # kh*kw shifted-window matmuls on the MXU, accumulated in f32.
    for i in range(kh):
        for j in range(kw):
            if sh == 1:
                rows = x[i:i + oh]                      # (oh, Wp, Cin)
            else:
                rows = x[i:i + (oh - 1) * sh + 1:sh]
            if sw == 1:
                patch = rows[:, j:j + ow, :]            # (oh, ow, Cin)
            else:
                patch = rows[:, j:j + (ow - 1) * sw + 1:sw, :]
            patch2d = patch.reshape(oh * ow, patch.shape[-1])   # (oh*ow, Cin)
            acc = acc + jnp.dot(patch2d, w_ref[i, j],
                                preferred_element_type=jnp.float32)

    o_ref[0] = (acc + b_ref[...]).astype(o_ref.dtype)


def circular_conv2d(x, weight, bias, stride=1):
    """Pallas implementation of CircularConv2d.forward.

    x      : (B, Cin, H, W) float32  (NCHW, torch convention)
    weight : (Cout, Cin, kh, kw) float32
    bias   : (Cout,) float32
    returns (B, Cout, OH, OW) float32
    """
    if isinstance(stride, int):
        stride = (stride, stride)
    sh, sw = stride
    B, Cin, H, W = x.shape
    Cout, Cin_w, kh, kw = weight.shape
    assert Cin == Cin_w

    ph = _compute_padding(H, kh, sh)
    pw = _compute_padding(W, kw, sw)

    # Circular padding (jnp 'wrap' == torch 'circular' for pad <= size).
    xp = jnp.pad(x.astype(jnp.float32),
                 ((0, 0), (0, 0), (ph[0], ph[1]), (pw[0], pw[1])),
                 mode="wrap")
    Hp = H + ph[0] + ph[1]
    Wp = W + pw[0] + pw[1]
    oh = (Hp - kh) // sh + 1
    ow = (Wp - kw) // sw + 1

    # NHWC so Cin sits on lanes for the MXU contraction.
    x_nhwc = jnp.transpose(xp, (0, 2, 3, 1))                       # (B,Hp,Wp,Cin)

    # Weights -> (kh, kw, Cin, Cout_pad); pad Cout to a lane-dense 128-multiple
    # so the matmul output and the stores are full-lane (unmasked).
    cop = max(128, ((Cout + 127) // 128) * 128)
    w4 = jnp.transpose(weight.astype(jnp.float32), (2, 3, 1, 0))   # (kh,kw,Cin,Cout)
    w4 = jnp.pad(w4, ((0, 0), (0, 0), (0, 0), (0, cop - Cout)))
    b2 = jnp.pad(bias.astype(jnp.float32), (0, cop - Cout)).reshape(1, cop)

    kern = functools.partial(_circ_conv_kernel,
                             kh=kh, kw=kw, sh=sh, sw=sw, oh=oh, ow=ow)

    out = pl.pallas_call(
        kern,
        out_shape=jax.ShapeDtypeStruct((B, oh * ow, cop), jnp.float32),
        grid_spec=pltpu.PrefetchScalarGridSpec(
            num_scalar_prefetch=0,
            grid=(B,),
            in_specs=[
                pl.BlockSpec((1, Hp, Wp, Cin), lambda b: (b, 0, 0, 0)),   # image
                pl.BlockSpec((kh, kw, Cin, cop), lambda b: (0, 0, 0, 0)), # weights
                pl.BlockSpec((1, cop), lambda b: (0, 0)),                 # bias
            ],
            out_specs=pl.BlockSpec((1, oh * ow, cop), lambda b: (b, 0, 0)),
        ),
        compiler_params=pltpu.CompilerParams(
            dimension_semantics=("parallel",),
            vmem_limit_bytes=32 * 1024 * 1024),
    )(x_nhwc, w4, b2)

    out = out[:, :, :Cout].reshape(B, oh, ow, Cout)
    return jnp.transpose(out, (0, 3, 1, 2))                        # (B,Cout,OH,OW)


def circular_conv2d_ref(x, weight, bias, stride=(1, 1)):
    """Pure-JAX reference mirroring the torch forward exactly."""
    if isinstance(stride, int):
        stride = (stride, stride)
    sh, sw = stride
    _, _, H, W = x.shape
    _, _, kh, kw = weight.shape
    ph = _compute_padding(H, kh, sh)
    pw = _compute_padding(W, kw, sw)
    xp = jnp.pad(x.astype(jnp.float32),
                 ((0, 0), (0, 0), (ph[0], ph[1]), (pw[0], pw[1])),
                 mode="wrap")
    y = jax.lax.conv_general_dilated(
        xp, weight.astype(jnp.float32), window_strides=(sh, sw),
        padding="VALID", dimension_numbers=("NCHW", "OIHW", "NCHW"))
    return y + bias.astype(jnp.float32).reshape(1, -1, 1, 1)


if __name__ == "__main__":
    B, Cin, Cout, H, W, K = 2, 4, 8, 16, 16, 3

    key = jax.random.PRNGKey(0)
    k1, k2, k3 = jax.random.split(key, 3)
    x = jax.random.normal(k1, (B, Cin, H, W), jnp.float32)
    # torch nn.Conv2d-style uniform init scale
    bound = 1.0 / np.sqrt(Cin * K * K)
    w = jax.random.uniform(k2, (Cout, Cin, K, K), jnp.float32,
                           minval=-bound, maxval=bound)
    b = jax.random.uniform(k3, (Cout,), jnp.float32,
                           minval=-bound, maxval=bound)

    out = jax.block_until_ready(circular_conv2d(x, w, b, stride=1))
    ref = jax.block_until_ready(circular_conv2d_ref(x, w, b, stride=1))

    np.testing.assert_allclose(np.asarray(out), np.asarray(ref),
                               rtol=2e-3, atol=2e-3)
    print("KERNEL_OK")
</pallas_src>

<mosaic_0001>
module attributes {stable_mosaic.version = 11 : i64} {
  func.func @_circ_conv_kernel(%arg0: i32, %arg1: memref<1x18x18x4xf32, #tpu.memory_space<vmem>>, %arg2: memref<3x3x4x128xf32, #tpu.memory_space<vmem>>, %arg3: memref<1x128xf32, #tpu.memory_space<vmem>>, %arg4: memref<1x256x128xf32, #tpu.memory_space<vmem>>) attributes {dimension_semantics = [#tpu.dimension_semantics<parallel>], iteration_bounds = array<i64: 2>, scalar_prefetch = 0 : i64, scratch_operands = 0 : i64, tpu.core_type = #tpu.core_type<tc>, window_params = [{transform_indices = @transform_0, window_bounds = array<i64: 1, 18, 18, 4>}, {pipeline_mode = #tpu.pipeline_mode<synchronous>, transform_indices = @transform_1, window_bounds = array<i64: 3, 3, 4, 128>}, {pipeline_mode = #tpu.pipeline_mode<synchronous>, transform_indices = @transform_2, window_bounds = array<i64: 1, 128>}, {transform_indices = @transform_3, window_bounds = array<i64: 1, 256, 128>}]} {
    %c0 = arith.constant 0 : index
    %c0_0 = arith.constant 0 : index
    %c0_1 = arith.constant 0 : index
    %c0_2 = arith.constant 0 : index
    %0 = vector.load %arg1[%c0, %c0_0, %c0_1, %c0_2] : memref<1x18x18x4xf32, #tpu.memory_space<vmem>>, vector<1x18x18x4xf32>
    %1 = vector.shape_cast %0 : vector<1x18x18x4xf32> to vector<18x18x4xf32>
    %cst = arith.constant 0.000000e+00 : f32
    %2 = vector.broadcast %cst : f32 to vector<256x128xf32>
    %3 = vector.extract_strided_slice %1 {offsets = [0, 0, 0], sizes = [16, 18, 4], strides = [1, 1, 1]} : vector<18x18x4xf32> to vector<16x18x4xf32>
    %4 = vector.extract_strided_slice %3 {offsets = [0, 0, 0], sizes = [16, 16, 4], strides = [1, 1, 1]} : vector<16x18x4xf32> to vector<16x16x4xf32>
    %5 = vector.shape_cast %4 : vector<16x16x4xf32> to vector<256x4xf32>
    %c0_3 = arith.constant 0 : index
    %c0_4 = arith.constant 0 : index
    %c0_5 = arith.constant 0 : index
    %c0_6 = arith.constant 0 : index
    %6 = vector.load %arg2[%c0_3, %c0_4, %c0_5, %c0_6] : memref<3x3x4x128xf32, #tpu.memory_space<vmem>>, vector<1x1x4x128xf32>
    %7 = vector.shape_cast %6 : vector<1x1x4x128xf32> to vector<4x128xf32>
    %cst_7 = arith.constant dense<0.000000e+00> : vector<256x128xf32>
    %8 = tpu.matmul %5, %7, %cst_7 {dimension_numbers = #tpu.dot_dimension_numbers<[1], [0], [0], [1], [0, 0, 1, 1], [], []>} : vector<256x4xf32>, vector<4x128xf32>, vector<256x128xf32> -> vector<256x128xf32>
    %9 = arith.addf %2, %8 : vector<256x128xf32>
    %10 = vector.extract_strided_slice %1 {offsets = [0, 0, 0], sizes = [16, 18, 4], strides = [1, 1, 1]} : vector<18x18x4xf32> to vector<16x18x4xf32>
    %11 = vector.extract_strided_slice %10 {offsets = [0, 1, 0], sizes = [16, 16, 4], strides = [1, 1, 1]} : vector<16x18x4xf32> to vector<16x16x4xf32>
    %12 = vector.shape_cast %11 : vector<16x16x4xf32> to vector<256x4xf32>
    %c0_8 = arith.constant 0 : index
    %c1 = arith.constant 1 : index
    %c0_9 = arith.constant 0 : index
    %c0_10 = arith.constant 0 : index
    %13 = vector.load %arg2[%c0_8, %c1, %c0_9, %c0_10] : memref<3x3x4x128xf32, #tpu.memory_space<vmem>>, vector<1x1x4x128xf32>
    %14 = vector.shape_cast %13 : vector<1x1x4x128xf32> to vector<4x128xf32>
    %cst_11 = arith.constant dense<0.000000e+00> : vector<256x128xf32>
    %15 = tpu.matmul %12, %14, %cst_11 {dimension_numbers = #tpu.dot_dimension_numbers<[1], [0], [0], [1], [0, 0, 1, 1], [], []>} : vector<256x4xf32>, vector<4x128xf32>, vector<256x128xf32> -> vector<256x128xf32>
    %16 = arith.addf %9, %15 : vector<256x128xf32>
    %17 = vector.extract_strided_slice %1 {offsets = [0, 0, 0], sizes = [16, 18, 4], strides = [1, 1, 1]} : vector<18x18x4xf32> to vector<16x18x4xf32>
    %18 = vector.extract_strided_slice %17 {offsets = [0, 2, 0], sizes = [16, 16, 4], strides = [1, 1, 1]} : vector<16x18x4xf32> to vector<16x16x4xf32>
    %19 = vector.shape_cast %18 : vector<16x16x4xf32> to vector<256x4xf32>
    %c0_12 = arith.constant 0 : index
    %c2 = arith.constant 2 : index
    %c0_13 = arith.constant 0 : index
    %c0_14 = arith.constant 0 : index
    %20 = vector.load %arg2[%c0_12, %c2, %c0_13, %c0_14] : memref<3x3x4x128xf32, #tpu.memory_space<vmem>>, vector<1x1x4x128xf32>
    %21 = vector.shape_cast %20 : vector<1x1x4x128xf32> to vector<4x128xf32>
    %cst_15 = arith.constant dense<0.000000e+00> : vector<256x128xf32>
    %22 = tpu.matmul %19, %21, %cst_15 {dimension_numbers = #tpu.dot_dimension_numbers<[1], [0], [0], [1], [0, 0, 1, 1], [], []>} : vector<256x4xf32>, vector<4x128xf32>, vector<256x128xf32> -> vector<256x128xf32>
    %23 = arith.addf %16, %22 : vector<256x128xf32>
    %24 = vector.extract_strided_slice %1 {offsets = [1, 0, 0], sizes = [16, 18, 4], strides = [1, 1, 1]} : vector<18x18x4xf32> to vector<16x18x4xf32>
    %25 = vector.extract_strided_slice %24 {offsets = [0, 0, 0], sizes = [16, 16, 4], strides = [1, 1, 1]} : vector<16x18x4xf32> to vector<16x16x4xf32>
    %26 = vector.shape_cast %25 : vector<16x16x4xf32> to vector<256x4xf32>
    %c1_16 = arith.constant 1 : index
    %c0_17 = arith.constant 0 : index
    %c0_18 = arith.constant 0 : index
    %c0_19 = arith.constant 0 : index
    %27 = vector.load %arg2[%c1_16, %c0_17, %c0_18, %c0_19] : memref<3x3x4x128xf32, #tpu.memory_space<vmem>>, vector<1x1x4x128xf32>
    %28 = vector.shape_cast %27 : vector<1x1x4x128xf32> to vector<4x128xf32>
    %cst_20 = arith.constant dense<0.000000e+00> : vector<256x128xf32>
    %29 = tpu.matmul %26, %28, %cst_20 {dimension_numbers = #tpu.dot_dimension_numbers<[1], [0], [0], [1], [0, 0, 1, 1], [], []>} : vector<256x4xf32>, vector<4x128xf32>, vector<256x128xf32> -> vector<256x128xf32>
    %30 = arith.addf %23, %29 : vector<256x128xf32>
    %31 = vector.extract_strided_slice %1 {offsets = [1, 0, 0], sizes = [16, 18, 4], strides = [1, 1, 1]} : vector<18x18x4xf32> to vector<16x18x4xf32>
    %32 = vector.extract_strided_slice %31 {offsets = [0, 1, 0], sizes = [16, 16, 4], strides = [1, 1, 1]} : vector<16x18x4xf32> to vector<16x16x4xf32>
    %33 = vector.shape_cast %32 : vector<16x16x4xf32> to vector<256x4xf32>
    %c1_21 = arith.constant 1 : index
    %c1_22 = arith.constant 1 : index
    %c0_23 = arith.constant 0 : index
    %c0_24 = arith.constant 0 : index
    %34 = vector.load %arg2[%c1_21, %c1_22, %c0_23, %c0_24] : memref<3x3x4x128xf32, #tpu.memory_space<vmem>>, vector<1x1x4x128xf32>
    %35 = vector.shape_cast %34 : vector<1x1x4x128xf32> to vector<4x128xf32>
    %cst_25 = arith.constant dense<0.000000e+00> : vector<256x128xf32>
    %36 = tpu.matmul %33, %35, %cst_25 {dimension_numbers = #tpu.dot_dimension_numbers<[1], [0], [0], [1], [0, 0, 1, 1], [], []>} : vector<256x4xf32>, vector<4x128xf32>, vector<256x128xf32> -> vector<256x128xf32>
    %37 = arith.addf %30, %36 : vector<256x128xf32>
    %38 = vector.extract_strided_slice %1 {offsets = [1, 0, 0], sizes = [16, 18, 4], strides = [1, 1, 1]} : vector<18x18x4xf32> to vector<16x18x4xf32>
    %39 = vector.extract_strided_slice %38 {offsets = [0, 2, 0], sizes = [16, 16, 4], strides = [1, 1, 1]} : vector<16x18x4xf32> to vector<16x16x4xf32>
    %40 = vector.shape_cast %39 : vector<16x16x4xf32> to vector<256x4xf32>
    %c1_26 = arith.constant 1 : index
    %c2_27 = arith.constant 2 : index
    %c0_28 = arith.constant 0 : index
    %c0_29 = arith.constant 0 : index
    %41 = vector.load %arg2[%c1_26, %c2_27, %c0_28, %c0_29] : memref<3x3x4x128xf32, #tpu.memory_space<vmem>>, vector<1x1x4x128xf32>
    %42 = vector.shape_cast %41 : vector<1x1x4x128xf32> to vector<4x128xf32>
    %cst_30 = arith.constant dense<0.000000e+00> : vector<256x128xf32>
    %43 = tpu.matmul %40, %42, %cst_30 {dimension_numbers = #tpu.dot_dimension_numbers<[1], [0], [0], [1], [0, 0, 1, 1], [], []>} : vector<256x4xf32>, vector<4x128xf32>, vector<256x128xf32> -> vector<256x128xf32>
    %44 = arith.addf %37, %43 : vector<256x128xf32>
    %45 = vector.extract_strided_slice %1 {offsets = [2, 0, 0], sizes = [16, 18, 4], strides = [1, 1, 1]} : vector<18x18x4xf32> to vector<16x18x4xf32>
    %46 = vector.extract_strided_slice %45 {offsets = [0, 0, 0], sizes = [16, 16, 4], strides = [1, 1, 1]} : vector<16x18x4xf32> to vector<16x16x4xf32>
    %47 = vector.shape_cast %46 : vector<16x16x4xf32> to vector<256x4xf32>
    %c2_31 = arith.constant 2 : index
    %c0_32 = arith.constant 0 : index
    %c0_33 = arith.constant 0 : index
    %c0_34 = arith.constant 0 : index
    %48 = vector.load %arg2[%c2_31, %c0_32, %c0_33, %c0_34] : memref<3x3x4x128xf32, #tpu.memory_space<vmem>>, vector<1x1x4x128xf32>
    %49 = vector.shape_cast %48 : vector<1x1x4x128xf32> to vector<4x128xf32>
    %cst_35 = arith.constant dense<0.000000e+00> : vector<256x128xf32>
    %50 = tpu.matmul %47, %49, %cst_35 {dimension_numbers = #tpu.dot_dimension_numbers<[1], [0], [0], [1], [0, 0, 1, 1], [], []>} : vector<256x4xf32>, vector<4x128xf32>, vector<256x128xf32> -> vector<256x128xf32>
    %51 = arith.addf %44, %50 : vector<256x128xf32>
    %52 = vector.extract_strided_slice %1 {offsets = [2, 0, 0], sizes = [16, 18, 4], strides = [1, 1, 1]} : vector<18x18x4xf32> to vector<16x18x4xf32>
    %53 = vector.extract_strided_slice %52 {offsets = [0, 1, 0], sizes = [16, 16, 4], strides = [1, 1, 1]} : vector<16x18x4xf32> to vector<16x16x4xf32>
    %54 = vector.shape_cast %53 : vector<16x16x4xf32> to vector<256x4xf32>
    %c2_36 = arith.constant 2 : index
    %c1_37 = arith.constant 1 : index
    %c0_38 = arith.constant 0 : index
    %c0_39 = arith.constant 0 : index
    %55 = vector.load %arg2[%c2_36, %c1_37, %c0_38, %c0_39] : memref<3x3x4x128xf32, #tpu.memory_space<vmem>>, vector<1x1x4x128xf32>
    %56 = vector.shape_cast %55 : vector<1x1x4x128xf32> to vector<4x128xf32>
    %cst_40 = arith.constant dense<0.000000e+00> : vector<256x128xf32>
    %57 = tpu.matmul %54, %56, %cst_40 {dimension_numbers = #tpu.dot_dimension_numbers<[1], [0], [0], [1], [0, 0, 1, 1], [], []>} : vector<256x4xf32>, vector<4x128xf32>, vector<256x128xf32> -> vector<256x128xf32>
    %58 = arith.addf %51, %57 : vector<256x128xf32>
    %59 = vector.extract_strided_slice %1 {offsets = [2, 0, 0], sizes = [16, 18, 4], strides = [1, 1, 1]} : vector<18x18x4xf32> to vector<16x18x4xf32>
    %60 = vector.extract_strided_slice %59 {offsets = [0, 2, 0], sizes = [16, 16, 4], strides = [1, 1, 1]} : vector<16x18x4xf32> to vector<16x16x4xf32>
    %61 = vector.shape_cast %60 : vector<16x16x4xf32> to vector<256x4xf32>
    %c2_41 = arith.constant 2 : index
    %c2_42 = arith.constant 2 : index
    %c0_43 = arith.constant 0 : index
    %c0_44 = arith.constant 0 : index
    %62 = vector.load %arg2[%c2_41, %c2_42, %c0_43, %c0_44] : memref<3x3x4x128xf32, #tpu.memory_space<vmem>>, vector<1x1x4x128xf32>
    %63 = vector.shape_cast %62 : vector<1x1x4x128xf32> to vector<4x128xf32>
    %cst_45 = arith.constant dense<0.000000e+00> : vector<256x128xf32>
    %64 = tpu.matmul %61, %63, %cst_45 {dimension_numbers = #tpu.dot_dimension_numbers<[1], [0], [0], [1], [0, 0, 1, 1], [], []>} : vector<256x4xf32>, vector<4x128xf32>, vector<256x128xf32> -> vector<256x128xf32>
    %65 = arith.addf %58, %64 : vector<256x128xf32>
    %c0_46 = arith.constant 0 : index
    %c0_47 = arith.constant 0 : index
    %66 = vector.load %arg3[%c0_46, %c0_47] : memref<1x128xf32, #tpu.memory_space<vmem>>, vector<1x128xf32>
    %67 = vector.broadcast %66 : vector<1x128xf32> to vector<256x128xf32>
    %68 = arith.addf %65, %67 : vector<256x128xf32>
    %c0_48 = arith.constant 0 : index
    %c0_49 = arith.constant 0 : index
    %c0_50 = arith.constant 0 : index
    %69 = vector.load %arg4[%c0_48, %c0_49, %c0_50] : memref<1x256x128xf32, #tpu.memory_space<vmem>>, vector<1x256x128xf32>
    %70 = vector.shape_cast %69 : vector<1x256x128xf32> to vector<256x128xf32>
    %71 = vector.shape_cast %68 : vector<256x128xf32> to vector<1x256x128xf32>
    tpu.vector_store %arg4[%c0_48, %c0_49, %c0_50], %71 {strides = array<i32>} : memref<1x256x128xf32, #tpu.memory_space<vmem>>, vector<1x256x128xf32>,
    return
  }
  func.func @transform_0(%arg0: i32) -> (i32, i32, i32, i32) {
    %c0_i32 = arith.constant 0 : i32
    %c0_i32_0 = arith.constant 0 : i32
    %c0_i32_1 = arith.constant 0 : i32
    %c0_i32_2 = arith.constant 0 : i32
    return %arg0, %c0_i32, %c0_i32_0, %c0_i32_1 : i32, i32, i32, i32
  }
  func.func @transform_1(%arg0: i32) -> (i32, i32, i32, i32) {
    %c0_i32 = arith.constant 0 : i32
    %c0_i32_0 = arith.constant 0 : i32
    %c0_i32_1 = arith.constant 0 : i32
    %c0_i32_2 = arith.constant 0 : i32
    %c0_i32_3 = arith.constant 0 : i32
    return %c0_i32, %c0_i32_0, %c0_i32_1, %c0_i32_2 : i32, i32, i32, i32
  }
  func.func @transform_2(%arg0: i32) -> (i32, i32) {
    %c0_i32 = arith.constant 0 : i32
    %c0_i32_0 = arith.constant 0 : i32
    %c0_i32_1 = arith.constant 0 : i32
    return %c0_i32, %c0_i32_0 : i32, i32
  }
  func.func @transform_3(%arg0: i32) -> (i32, i32, i32) {
    %c0_i32 = arith.constant 0 : i32
    %c0_i32_0 = arith.constant 0 : i32
    %c0_i32_1 = arith.constant 0 : i32
    return %arg0, %c0_i32, %c0_i32_0 : i32, i32, i32
  }
}

</mosaic_0001>

<bundles_post_ra>
// kernel: tpu_custom_call.1
= control target key start
LH: loop header
LB: loop body
LE: loop exit
PB: predicated region body
PF: predicated region fallthrough
CT: control target
= control target key end

     0   :  { %8 = vsyncpa [#allocation3], 0  ;;  %s6070_s0 = inlined_call_operand.vmem [shape: f32[2,18,18,4], index: 0, kind: input, shape index: {}]   ;;  %s6071_s1 = inlined_call_operand.vmem [shape: f32[3,3,4,128], index: 1, kind: input, shape index: {}]   ;;  %s6072_s2 = inlined_call_operand.vmem [shape: f32[1,128], index: 2, kind: input, shape index: {}]   ;;  %s6073_s3 = inlined_call_operand.hbm [shape: f32[2,256,128], index: 3, kind: output, shape index: {}]  }
   0x1   :  { %10 = vsyncpa [#allocation3 + $0x1], 0  ;;  %s4311_s12 = smov 0   ;;  %s4313_s13 = smov 0  }
   0x2   :  { %s4315_s14 = smov 0   ;;  %s4317_s15 = smov 0  }
   0x3 LB: > { %s4332_s16 = sadd.s32 4294967295, %s4286_s15   ;;  %s3117_s17 = sadd.s32 4294967294, %s4286_s15   ;;  %s4286_s15 = sphi %s4317_s15, %s6373_s15   ;;  %s4282_s14 = sphi %s4315_s14, %s6372_s14   ;;  %s4278_s13 = sphi %s4313_s13, %s6371_s13   ;;  %s4274_s12 = sphi %s4311_s12, %s6370_s12  }
   0x4   : > { %s4336_s18 = sadd.s32 1, %s4286_s15   ;;  %s91_s19 = sadd.s32 1, %s4282_s14 }
   0x5   : > { %s88_s20 = ssub.s32 %s4286_s15, %s4336_s18  ;;  %p101_p0 = scmp.ne.s32.totalorder %s4282_s14, %s4278_s13 }
   0x6   : > { %p89_p1 = scmp.eq.s32.totalorder %s88_s20, 0  ;;  %p102_p2 = scmp.eq.s32.totalorder %s4332_s16, 1 }
   0x7   : > { %p107_p3 = scmp.ne.s32.totalorder %s4278_s13, %s4274_s12  ;;  %p108_p4 = scmp.eq.s32.totalorder %s3117_s17, 1 }
   0x8   : > { %s4347_s21 = scalar_select %p89_p1, %s4282_s14, %s91_s19  }
   0x9   : > { %p4349_p5 = por %p102_p2, %p101_p0  ;;  %p4353_p6 = por %p108_p4, %p107_p3 }
   0xa   : > { %p3120_p7 = scmp.ge.s32.totalorder %s4286_s15, 1  ;;  %p140_p8 = scmp.lt.s32.totalorder %s4286_s15, 3 }
   0xc   : > { %p141_p9 = pnand %p3120_p7, %p140_p8 }
   0xe   : > { %144 = sbr.rel (%p141_p9) target bundleno = 531 (0x213), region = 32 }
  0x13   : > { %v3123_v0 = vld [vmem:[%s6071_s1 + $0x4] sm:$0xf]  ;;  %vm420_vm0 = vcmask 1043456   ;;  %p164_p10 = scmp.lt.s32.totalorder %s4332_s16, 1  ;;  %v223_v1 = vld [vmem:[%s6071_s1] sm:$0xf] }
  0x14   : > { %4182 = vmatprep.subr.msk.mxu1 %vm420_vm0, %v3123_v0  ;;  %3732 = vmatprep.subr.msk.mxu0 %vm420_vm0, %v3123_v0  ;;  %v3190_v2 = vld [vmem:[%s6071_s1 + $0x8] sm:$0xf]  ;;  %vm272_vm1 = vcmask 1046528   ;;  %vm355_vm2 = vcmask 31744   ;;  %v4422_v21 = vld [vmem:[%s6071_s1 + $0xc] sm:$0xf] }
  0x15   : > { %4183 = vmatpush3.msk.msra.mxu1 %vm420_vm0, %v3123_v0  ;;  %3733 = vmatpush3.msk.msra.mxu0 %vm420_vm0, %v3123_v0  ;;  %s165_s30 = scalar_select %p164_p10, %s4332_s16, 1  ;;  %v4440_v28 = vld [vmem:[%s6071_s1 + $0x10] sm:$0xf]  ;;  %vm941_vm3 = vcmask 1045504  }
  0x16   : > { %3782 = vmatprep.subr.msk.mxu1 %vm420_vm0, %v223_v1  ;;  %3832 = vmatprep.subr.msk.mxu0 %vm420_vm0, %v3190_v2  ;;  %s161_s29 = sand.u32 1, %s4278_s13   ;;  %s4288_s19 = smov [#allocation2]  }
  0x17   : > { %s4184_s4 = smul.u32 432, %s165_s30  ;;  %s3121_s30 = sshll.u32 %s161_s29, 8 }
  0x18   : > { %s5877_s6 = scalar_lea.vmem [#allocation2], %s3121_s30  ;;  %s4230_s20 = sshll.u32 %s4288_s19, 4  ;;  %s4231_s20 = int_to_ptr.vmem [resolvable:$false] %s4230_s20 }
  0x19   : > { %s4379_s7 = scalar_lea.vmem %s6070_s0, %s4184_s4  ;;  %s3055_s8 = sshll.u32 %s5877_s6, 4  ;;  %s6023_s8 = int_to_ptr.vmem [resolvable:$true] %s3055_s8 }
  0x1a   : > { %v4382_v3 = vld [vmem:[%s4379_s7] sm:$0xff]  ;;  %v4385_v4 = vld [vmem:[%s4379_s7 + $0x8] sm:$0xff]  ;;  %v4397_v10 = vld [vmem:[%s4379_s7 + $0x10] sm:$0x3]  ;;  %s4226_s17 = scalar_lea.vmem %s6023_s8, 4096  ;;  %s4232_s24 = scalar_lea.vmem %s4231_s20, 8192 }
  0x1b   : > { %v4388_v5 = vld [vmem:[%s4379_s7 + $0xc0] sm:$0xff]  ;;  %v273_v6 = vrot.slane %v4382_v3, 1  ;;  %v274_v7 = vrot.slane %v4385_v4, 1  ;;  %v4393_v8 = vld [vmem:[%s4379_s7 + $0xc8] sm:$0xff]  ;;  %v276_v12 = vrot.slane %v4397_v10, 1  ;;  %v4405_v14 = vld [vmem:[%s4379_s7 + $0x18] sm:$0xff]  ;;  %p4227_p11 = scmp.ne.s32.totalorder %s6023_s8, %s4226_s17  ;;  %p4233_p0 = scmp.lt.s32.totalorder %s6023_s8, %s4231_s20 }
  0x1c   : > { %v313_v9 = vrot.slane %v4388_v5, 1  ;;  %v314_v11 = vrot.slane %v4393_v8, 1  ;;  %v4402_v13 = vld [vmem:[%s4379_s7 + $0xd0] sm:$0x3]  ;;  %v4410_v17 = vld [vmem:[%s4379_s7 + $0x20] sm:$0xff]  ;;  %v278_v18 = vrot.slane %v4405_v14, 1  ;;  %p4234_p1 = scmp.lt.s32.totalorder %s4232_s24, %s4226_s17 }
  0x1d   : > { %v275_v15 = vsel %vm272_vm1, %v273_v6, %v274_v7  ;;  %v316_v16 = vrot.slane %v4402_v13, 1  ;;  %v4414_v19 = vld [vmem:[%s4379_s7 + $0xd8] sm:$0xff]  ;;  %v4417_v20 = vld [vmem:[%s4379_s7 + $0xe0] sm:$0xff]  ;;  %v277_v23 = vsel %vm272_vm1, %v274_v7, %v276_v12  ;;  %v279_v24 = vrot.slane %v4410_v17, 1  ;;  %v4432_v26 = vld [vmem:[%s4379_s7 + $0x28] sm:$0x3]  ;;  %p4228_p12 = pnand %p4227_p11, %p4349_p5 }
  0x1e   : > { %3734 = vmatprep.mubr.msk.f32.mxu0 %vm355_vm2, %v275_v15  ;;  %v4426_v22 = vsel %vm272_vm1, %v313_v9, %v314_v11  ;;  %v318_v25 = vrot.slane %v4414_v19, 1  ;;  %v4435_v27 = vld [vmem:[%s4379_s7 + $0xe8] sm:$0x3]  ;;  %v319_v30 = vrot.slane %v4417_v20, 1  ;;  %v281_v31 = vrot.slane %v4432_v26, 1  ;;  %v4452_v33 = vld [vmem:[%s4379_s7 + $0x30] sm:$0xff]  ;;  %p4235_p2 = por %p4234_p1, %p4233_p0 }
  0x1f   : > { %6158 = vst [vmem:[#allocation5_spill] sm:$0xff] %v4426_v22  ;;  %3758 = vmatprep.mubr.msk.f32.mxu1 %vm355_vm2, %v4426_v22  ;;  %3735 = vmatmul.mubr.msk.f32.vlgmr.msra.gmra.mxu0 %vm355_vm2, %v277_v23  ;;  %v4446_v29 = vsel %vm272_vm1, %v314_v11, %v316_v16  ;;  %v321_v32 = vrot.slane %v4435_v27, 1  ;;  %v4455_v34 = vld [vmem:[%s4379_s7 + $0x38] sm:$0xff]  ;;  %v4458_v35 = vld [vmem:[%s4379_s7 + $0xf0] sm:$0xff]  ;;  %v4464_v36 = vsel %vm272_vm1, %v278_v18, %v279_v24  ;;  %v283_v37 = vrot.slane %v4452_v33, 1  ;;  %v4492_v47 = vld [vmem:[%s4379_s7 + $0x48] sm:$0xff]  ;;  %p4229_p13 = pneg %p4228_p12 }
  0x20   : > { %6159 = vst [vmem:[#allocation6_spill] sm:$0xff] %v4446_v29  ;;  %3759 = vmatmul.mubr.msk.f32.vlgmr.msra.gmra.mxu1 %vm355_vm2, %v4446_v29  ;;  %3833 = vmatpush3.msk.msra.mxu0 %vm420_vm0, %v3190_v2  ;;  %6160 = vst [vmem:[#allocation7_spill] sm:$0xff] %v4464_v36  ;;  %v284_v38 = vrot.slane %v4455_v34, 1  ;;  %v4469_v39 = vld [vmem:[%s4379_s7 + $0xf8] sm:$0xff]  ;;  %v323_v40 = vrot.slane %v4458_v35, 1  ;;  %v4479_v42 = vsel %vm272_vm1, %v318_v25, %v319_v30  ;;  %v4495_v48 = vld [vmem:[%s4379_s7 + $0x50] sm:$0xff] }
  0x21   : > { %v4473_v41 = vld [vmem:[%s4379_s7 + $0x40] sm:$0x3]  ;;  %3783 = vmatpush3.msk.msra.mxu1 %vm420_vm0, %v223_v1  ;;  %3737 = vmatprep.mubr.msk.f32.mxu0 %vm355_vm2, %v4464_v36  ;;  %6161 = vst [vmem:[#allocation8_spill] sm:$0xff] %v4479_v42  ;;  %v4482_v43 = vsel %vm272_vm1, %v279_v24, %v281_v31  ;;  %v4485_v44 = vsel %vm272_vm1, %v319_v30, %v321_v32  ;;  %v324_v45 = vrot.slane %v4469_v39, 1  ;;  %v288_v52 = vrot.slane %v4492_v47, 1  ;;  %v4506_v53 = vld [vmem:[%s4379_s7 + $0x108] sm:$0xff]  ;;  %p4236_p3 = pnand %p4235_p2, %p4229_p13 }
  0x22   : > { %6162 = vst [vmem:[#allocation9_spill] sm:$0xff] %v4482_v43  ;;  %6163 = vst [vmem:[#allocation10_spill] sm:$0xff] %v4485_v44  ;;  %v4489_v46 = vld [vmem:[%s4379_s7 + $0x100] sm:$0x3]  ;;  %3761 = vmatprep.mubr.msk.f32.mxu1 %vm355_vm2, %v4479_v42  ;;  %v4500_v49 = vsel %vm272_vm1, %v283_v37, %v284_v38  ;;  %v286_v50 = vrot.slane %v4473_v41, 1  ;;  %v4509_v54 = vld [vmem:[%s4379_s7 + $0x110] sm:$0xff]  ;;  %3882 = vmatprep.subr.msk.mxu1 %vm420_vm0, %v4422_v21 }
  0x23   : > { %6164 = vst [vmem:[#allocation11_spill] sm:$0xff] %v4500_v49  ;;  %v326_v51 = vrot.slane %v4489_v46, 1  ;;  %v4512_v55 = vld [vmem:[%s4379_s7 + $0x60] sm:$0xff]  ;;  %3738 = vmatmul.mubr.msk.f32.gmra.mxu0 %vm355_vm2, %v4482_v43  ;;  %v4519_v56 = vsel %vm272_vm1, %v323_v40, %v324_v45  ;;  %v289_v57 = vrot.slane %v4495_v48, 1  ;;  %v328_v58 = vrot.slane %v4506_v53, 1  ;;  %v4528_v61 = vld [vmem:[%s4379_s7 + $0x68] sm:$0xff]  ;;  %3932 = vmatprep.subr.msk.mxu0 %vm420_vm0, %v4440_v28 }
  0x24   : > { %6165 = vst [vmem:[#allocation12_spill] sm:$0xff] %v4519_v56  ;;  %v329_v59 = vrot.slane %v4509_v54, 1  ;;  %v4525_v60 = vld [vmem:[%s4379_s7 + $0x58] sm:$0x3]  ;;  %3762 = vmatmul.mubr.msk.f32.gmra.mxu1 %vm355_vm2, %v4485_v44  ;;  %3740 = vmatprep.mubr.msk.f32.mxu0 %vm355_vm2, %v4500_v49  ;;  %v4537_v62 = vsel %vm272_vm1, %v284_v38, %v286_v50  ;;  %v293_v1 = vrot.slane %v4512_v55, 1  ;;  %v4545_v2 = vld [vmem:[%s4379_s7 + $0x120] sm:$0xff] }
  0x25   : > { %6166 = vst [vmem:[#allocation13_spill] sm:$0xff] %v4537_v62  ;;  %v291_v63 = vrot.slane %v4525_v60, 1  ;;  %v4541_v0 = vld [vmem:[%s4379_s7 + $0x118] sm:$0x3]  ;;  %v4548_v6 = vld [vmem:[%s4379_s7 + $0x128] sm:$0xff]  ;;  %3764 = vmatprep.mubr.msk.f32.mxu1 %vm355_vm2, %v4519_v56  ;;  %v4553_v7 = vsel %vm272_vm1, %v324_v45, %v326_v51  ;;  %v4556_v9 = vsel %vm272_vm1, %v288_v52, %v289_v57  ;;  %v294_v12 = vrot.slane %v4528_v61, 1 }
  0x26   : > { %6167 = vst [vmem:[#allocation14_spill] sm:$0xff] %v4553_v7  ;;  %6168 = vst [vmem:[#allocation15_spill] sm:$0xff] %v4556_v9  ;;  %v331_v11 = vrot.slane %v4541_v0, 1  ;;  %v4561_v15 = vld [vmem:[%s4379_s7 + $0x70] sm:$0x3]  ;;  %v4567_v18 = vsel %vm272_vm1, %v328_v58, %v329_v59  ;;  %v333_v23 = vrot.slane %v4545_v2, 1 }
  0x27   : > { %v4564_v16 = vld [vmem:[%s4379_s7 + $0x130] sm:$0x3]  ;;  %6169 = vst [vmem:[#allocation16_spill] sm:$0xff] %v4567_v18  ;;  %v334_v24 = vrot.slane %v4548_v6, 1  ;;  %v4572_v25 = vld [vmem:[%s4379_s7 + $0x78] sm:$0xff]  ;;  %v4575_v30 = vld [vmem:[%s4379_s7 + $0x80] sm:$0xff]  ;;  %3741 = vmatmul.mubr.msk.f32.gmra.mxu0 %vm355_vm2, %v4537_v62  ;;  %v4590_v37 = vsel %vm272_vm1, %v289_v57, %v291_v63  ;;  %v4600_v50 = vsel %vm272_vm1, %v293_v1, %v294_v12 }
  0x28   : > { %v4580_v31 = vld [vmem:[%s4379_s7 + $0x138] sm:$0xff]  ;;  %v4583_v32 = vld [vmem:[%s4379_s7 + $0x140] sm:$0xff]  ;;  %3765 = vmatmul.mubr.msk.f32.gmra.mxu1 %vm355_vm2, %v4553_v7  ;;  %3743 = vmatprep.mubr.msk.f32.mxu0 %vm355_vm2, %v4556_v9  ;;  %6170 = vst [vmem:[#allocation17_spill] sm:$0xff] %v4590_v37  ;;  %v296_v38 = vrot.slane %v4561_v15, 1  ;;  %v336_v40 = vrot.slane %v4564_v16, 1  ;;  %v4597_v45 = vsel %vm272_vm1, %v329_v59, %v331_v11  ;;  %6172 = vst [vmem:[#allocation19_spill] sm:$0xff] %v4600_v50 }
  0x29   : > { %3767 = vmatprep.mubr.msk.f32.mxu1 %vm355_vm2, %v4567_v18  ;;  %6171 = vst [vmem:[#allocation18_spill] sm:$0xff] %v4597_v45  ;;  %v298_v51 = vrot.slane %v4572_v25, 1  ;;  %v299_v52 = vrot.slane %v4575_v30, 1  ;;  %v4605_v57 = vld [vmem:[%s4379_s7 + $0x88] sm:$0x3]  ;;  %v4611_v63 = vsel %vm272_vm1, %v333_v23, %v334_v24  ;;  %v338_v7 = vrot.slane %v4580_v31, 1 }
  0x2a   : > { %v4608_v58 = vld [vmem:[%s4379_s7 + $0x148] sm:$0x3]  ;;  %6173 = vst [vmem:[#allocation20_spill] sm:$0xff] %v4611_v63  ;;  %v339_v18 = vrot.slane %v4583_v32, 1  ;;  %v4616_v59 = vld [vmem:[%s4379_s7 + $0x90] sm:$0xff]  ;;  %v4619_v1 = vld [vmem:[%s4379_s7 + $0x98] sm:$0xff]  ;;  %v4634_v23 = vsel %vm272_vm1, %v294_v12, %v296_v38  ;;  %v4641_v29 = vsel %vm272_vm1, %v334_v24, %v336_v40 }
  0x2b   : > { %3744 = vmatmul.mubr.msk.f32.gmra.mxu0 %vm355_vm2, %v4590_v37  ;;  %v4624_v11 = vld [vmem:[%s4379_s7 + $0x150] sm:$0xff]  ;;  %v4627_v56 = vld [vmem:[%s4379_s7 + $0x158] sm:$0xff]  ;;  %6175 = vst [vmem:[#allocation22_spill] sm:$0xff] %v4634_v23  ;;  %v301_v44 = vrot.slane %v4605_v57, 1  ;;  %v341_v42 = vrot.slane %v4608_v58, 1  ;;  %6176 = vst [vmem:[#allocation23_spill] sm:$0xff] %v4641_v29 }
  0x2c   : > { %6174 = vst [vmem:[#allocation21_spill] sm:$0xff] %v4627_v56  ;;  %3768 = vmatmul.mubr.msk.f32.gmra.mxu1 %vm355_vm2, %v4597_v45  ;;  %3746 = vmatprep.mubr.msk.f32.mxu0 %vm355_vm2, %v4600_v50  ;;  %v4644_v45 = vsel %vm272_vm1, %v298_v51, %v299_v52  ;;  %v303_v22 = vrot.slane %v4616_v59, 1  ;;  %v304_v12 = vrot.slane %v4619_v1, 1  ;;  %v4649_v38 = vld [vmem:[%s4379_s7 + $0xa0] sm:$0x3]  ;;  %v4652_v50 = vsel %vm272_vm1, %v338_v7, %v339_v18  ;;  %v4660_v24 = vld [vmem:[%s4379_s7 + $0xa8] sm:$0xff] }
  0x2d   : > { %3770 = vmatprep.mubr.msk.f32.mxu1 %vm355_vm2, %v4611_v63  ;;  %6177 = vst [vmem:[#allocation24_spill] sm:$0xff] %v4644_v45  ;;  %6178 = vst [vmem:[#allocation25_spill] sm:$0xff] %v4652_v50  ;;  %v343_v37 = vrot.slane %v4624_v11, 1  ;;  %v344_v9 = vrot.slane %v4627_v56, 1  ;;  %v4657_v63 = vld [vmem:[%s4379_s7 + $0x160] sm:$0x3]  ;;  %v4678_v7 = vsel %vm272_vm1, %v299_v52, %v301_v44  ;;  %v4681_v49 = vsel %vm272_vm1, %v339_v18, %v341_v42 }
  0x2e   : > { %v4663_v40 = vld [vmem:[%s4379_s7 + $0xb0] sm:$0xff]  ;;  %v4668_v51 = vld [vmem:[%s4379_s7 + $0x168] sm:$0xff]  ;;  %6180 = vst [vmem:[#allocation27_spill] sm:$0xff] %v4678_v7  ;;  %6181 = vst [vmem:[#allocation28_spill] sm:$0xff] %v4681_v49  ;;  %v306_v43 = vrot.slane %v4649_v38, 1  ;;  %v346_v36 = vrot.slane %v4657_v63, 1 }
  0x2f   : > { %3747 = vmatmul.mubr.msk.f32.gmra.mxu0 %vm355_vm2, %v4634_v23  ;;  %v4671_v62 = vld [vmem:[%s4379_s7 + $0x170] sm:$0xff]  ;;  %v4687_v23 = vsel %vm272_vm1, %v303_v22, %v304_v12  ;;  %v4693_v56 = vld [vmem:[%s4379_s7 + $0xb8] sm:$0x3]  ;;  %v4696_v44 = vsel %vm272_vm1, %v343_v37, %v344_v9  ;;  %v348_v42 = vrot.slane %v4668_v51, 1 }
  0x30   : > { %6179 = vst [vmem:[#allocation26_spill] sm:$0xff] %v4671_v62  ;;  %3771 = vmatmul.mubr.msk.f32.gmra.mxu1 %vm355_vm2, %v4641_v29  ;;  %3749 = vmatprep.mubr.msk.f32.mxu0 %vm355_vm2, %v4644_v45  ;;  %6182 = vst [vmem:[#allocation29_spill] sm:$0xff] %v4687_v23  ;;  %v308_v29 = vrot.slane %v4660_v24, 1  ;;  %v309_v45 = vrot.slane %v4663_v40, 1  ;;  %v349_v18 = vrot.slane %v4671_v62, 1  ;;  %v4710_v22 = vsel %vm272_vm1, %v304_v12, %v306_v43 }
  0x31   : > { %3773 = vmatprep.mubr.msk.f32.mxu1 %vm355_vm2, %v4652_v50  ;;  %6183 = vst [vmem:[#allocation30_spill] sm:$0xff] %v4696_v44  ;;  %v4701_v52 = vld [vmem:[%s4379_s7 + $0x178] sm:$0x3]  ;;  %6184 = vst [vmem:[#allocation31_spill] sm:$0xff] %v4710_v22  ;;  %v311_v37 = vrot.slane %v4693_v56, 1  ;;  %v942_v50 = vrot.slane %v4382_v3, 2  ;;  %v4717_v62 = vsel %vm272_vm1, %v344_v9, %v346_v36 }
  0x32   : > { %6185 = vst [vmem:[#allocation32_spill] sm:$0xff] %v4717_v62  ;;  %v4725_v43 = vsel %vm272_vm1, %v348_v42, %v349_v18  ;;  %v945_v12 = vrot.slane %v4397_v10, 2  ;;  %v947_v10 = vrot.slane %v4405_v14, 2  ;;  %v948_v42 = vrot.slane %v4410_v17, 2 }
  0x33   : > { %3750 = vmatmul.mubr.msk.f32.gmra.mxu0 %vm355_vm2, %v4678_v7  ;;  %v4720_v7 = vsel %vm272_vm1, %v308_v29, %v309_v45  ;;  %6187 = vst [vmem:[#allocation34_spill] sm:$0xff] %v4725_v43  ;;  %v4735_v29 = vsel %vm272_vm1, %v309_v45, %v311_v37  ;;  %v950_v37 = vrot.slane %v4432_v26, 2  ;;  %v955_v26 = vrot.slane %v4473_v41, 2 }
  0x34   : > { %3774 = vmatmul.mubr.msk.f32.gmra.mxu1 %vm355_vm2, %v4681_v49  ;;  %3752 = vmatprep.mubr.msk.f32.mxu0 %vm355_vm2, %v4687_v23  ;;  %6186 = vst [vmem:[#allocation33_spill] sm:$0xff] %v4720_v7  ;;  %v351_v49 = vrot.slane %v4701_v52, 1  ;;  %v943_v23 = vrot.slane %v4385_v4, 2  ;;  %6188 = vst [vmem:[#allocation35_spill] sm:$0xff] %v4735_v29  ;;  %v960_v41 = vrot.slane %v4525_v60, 2 }
  0x35   : > { %3776 = vmatprep.mubr.msk.f32.mxu1 %vm355_vm2, %v4696_v44 }
  0x36   : > { %v4740_v36 = vsel %vm272_vm1, %v349_v18, %v351_v49  ;;  %v944_v9 = vsel %vm941_vm3, %v942_v50, %v943_v23  ;;  %v946_v45 = vsel %vm941_vm3, %v943_v23, %v945_v12  ;;  %v952_v49 = vrot.slane %v4452_v33, 2  ;;  %v4776_v23 = vld [vmem:[%s6071_s1 + $0x18] sm:$0xf] }
  0x37   : > { %3753 = vmatmul.mubr.msk.f32.gmra.mxu0 %vm355_vm2, %v4710_v22  ;;  %6189 = vst [vmem:[#allocation36_spill] sm:$0xff] %v4740_v36  ;;  %v953_v50 = vrot.slane %v4455_v34, 2  ;;  %v4758_v18 = vsel %vm941_vm3, %v947_v10, %v948_v42  ;;  %v958_v12 = vrot.slane %v4495_v48, 2 }
  0x38   : > { %3777 = vmatmul.mubr.msk.f32.gmra.mxu1 %vm355_vm2, %v4717_v62  ;;  %3755 = vmatprep.mubr.msk.f32.mxu0 %vm355_vm2, %v4720_v7 }
  0x39   : > { %3779 = vmatprep.mubr.msk.f32.mxu1 %vm355_vm2, %v4725_v43  ;;  %v4817_v60 = vsel %vm941_vm3, %v958_v12, %v960_v41  ;;  %v972_v41 = vrot.slane %v4616_v59, 2 }
  0x3b   : > { %3756 = vmatmul.mubr.msk.f32.gmra.mxu0 %vm355_vm2, %v4735_v29 }
  0x3c   : > { %3780 = vmatmul.mubr.msk.f32.gmra.mxu1 %vm355_vm2, %v4740_v36  ;;  %3834 = vmatprep.mubr.msk.f32.mxu0 %vm355_vm2, %v944_v9  ;;  %v4763_v9 = vld [vmem:[%s6071_s1 + $0x14] sm:$0xf] }
  0x3d   : > { %3784 = vmatprep.mubr.msk.f32.mxu1 %vm355_vm2, %v4382_v3  ;;  %v4770_v3 = vsel %vm941_vm3, %v948_v42, %v950_v37  ;;  %v962_v42 = vrot.slane %v4512_v55, 2  ;;  %v965_v37 = vrot.slane %v4561_v15, 2 }
  0x3f   : > { %3835 = vmatmul.mubr.msk.f32.vlgmr.msra.gmra.mxu0 %vm355_vm2, %v946_v45  ;;  %v963_v45 = vrot.slane %v4528_v61, 2 }
  0x40   : > { %3785 = vmatmul.mubr.msk.f32.vlgmr.msra.gmra.mxu1 %vm355_vm2, %v4385_v4  ;;  %3933 = vmatpush3.msk.msra.mxu0 %vm420_vm0, %v4440_v28  ;;  %v4783_v4 = vsel %vm941_vm3, %v952_v49, %v953_v50  ;;  %v957_v28 = vrot.slane %v4492_v47, 2 }
  0x41   : > { %3883 = vmatpush3.msk.msra.mxu1 %vm420_vm0, %v4422_v21  ;;  %3787 = vmatprep.mubr.msk.f32.mxu1 %vm355_vm2, %v4405_v14  ;;  %v4800_v21 = vsel %vm941_vm3, %v953_v50, %v955_v26  ;;  %v4823_v49 = vsel %vm941_vm3, %v962_v42, %v963_v45  ;;  %v967_v50 = vrot.slane %v4572_v25, 2  ;;  %v968_v26 = vrot.slane %v4575_v30, 2 }
  0x42   : > { %3837 = vmatprep.mubr.msk.f32.mxu0 %vm355_vm2, %v4758_v18  ;;  %3982 = vmatprep.subr.msk.mxu1 %vm420_vm0, %v4763_v9  ;;  %v4806_v10 = vsel %vm941_vm3, %v957_v28, %v958_v12  ;;  %v4834_v15 = vsel %vm941_vm3, %v963_v45, %v965_v37  ;;  %v970_v28 = vrot.slane %v4605_v57, 2  ;;  %v973_v42 = vrot.slane %v4619_v1, 2 }
  0x43   : > { %3838 = vmatmul.mubr.msk.f32.gmra.mxu0 %vm355_vm2, %v4770_v3  ;;  %4032 = vmatprep.subr.msk.mxu0 %vm420_vm0, %v4776_v23  ;;  %6190 = vst [vmem:[#allocation37_spill] sm:$0xff] %v4834_v15  ;;  %v4840_v12 = vsel %vm941_vm3, %v967_v50, %v968_v26  ;;  %v975_v45 = vrot.slane %v4649_v38, 2  ;;  %v977_v50 = vrot.slane %v4660_v24, 2 }
  0x44   : > { %3788 = vmatmul.mubr.msk.f32.gmra.mxu1 %vm355_vm2, %v4410_v17  ;;  %3840 = vmatprep.mubr.msk.f32.mxu0 %vm355_vm2, %v4783_v4  ;;  %v4851_v57 = vsel %vm941_vm3, %v968_v26, %v970_v28  ;;  %v4857_v37 = vsel %vm941_vm3, %v972_v41, %v973_v42  ;;  %v980_v26 = vrot.slane %v4693_v56, 2  ;;  %v982_v41 = vrot.slane %v4388_v5, 2 }
  0x45   : > { %3790 = vmatprep.mubr.msk.f32.mxu1 %vm355_vm2, %v4452_v33  ;;  %6191 = vst [vmem:[#allocation38_spill] sm:$0xff] %v4851_v57  ;;  %v4868_v38 = vsel %vm941_vm3, %v973_v42, %v975_v45  ;;  %v985_v42 = vrot.slane %v4402_v13, 2 }
  0x46   : > { %6192 = vst [vmem:[#allocation39_spill] sm:$0xff] %v4868_v38 }
  0x47   : > { %3841 = vmatmul.mubr.msk.f32.gmra.mxu0 %vm355_vm2, %v4800_v21 }
  0x48   : > { %3791 = vmatmul.mubr.msk.f32.gmra.mxu1 %vm355_vm2, %v4455_v34  ;;  %3843 = vmatprep.mubr.msk.f32.mxu0 %vm355_vm2, %v4806_v10 }
  0x49   : > { %3793 = vmatprep.mubr.msk.f32.mxu1 %vm355_vm2, %v4492_v47 }
  0x4b   : > { %3844 = vmatmul.mubr.msk.f32.gmra.mxu0 %vm355_vm2, %v4817_v60 }
  0x4c   : > { %3794 = vmatmul.mubr.msk.f32.gmra.mxu1 %vm355_vm2, %v4495_v48  ;;  %3846 = vmatprep.mubr.msk.f32.mxu0 %vm355_vm2, %v4823_v49 }
  0x4d   : > { %3796 = vmatprep.mubr.msk.f32.mxu1 %vm355_vm2, %v4512_v55 }
  0x4f   : > { %3847 = vmatmul.mubr.msk.f32.gmra.mxu0 %vm355_vm2, %v4834_v15  ;;  %v978_v15 = vrot.slane %v4663_v40, 2 }
  0x50   : > { %3797 = vmatmul.mubr.msk.f32.gmra.mxu1 %vm355_vm2, %v4528_v61  ;;  %3849 = vmatprep.mubr.msk.f32.mxu0 %vm355_vm2, %v4840_v12 }
  0x51   : > { %3799 = vmatprep.mubr.msk.f32.mxu1 %vm355_vm2, %v4572_v25  ;;  %v4874_v28 = vsel %vm941_vm3, %v977_v50, %v978_v15  ;;  %v4885_v56 = vsel %vm941_vm3, %v978_v15, %v980_v26  ;;  %v987_v50 = vrot.slane %v4414_v19, 2  ;;  %v990_v15 = vrot.slane %v4435_v27, 2 }
  0x52   : > { %6193 = vst [vmem:[#allocation40_spill] sm:$0xff] %v4885_v56 }
  0x53   : > { %3850 = vmatmul.mubr.msk.f32.gmra.mxu0 %vm355_vm2, %v4851_v57  ;;  %v983_v57 = vrot.slane %v4393_v8, 2 }
  0x54   : > { %3800 = vmatmul.mubr.msk.f32.gmra.mxu1 %vm355_vm2, %v4575_v30  ;;  %3852 = vmatprep.mubr.msk.f32.mxu0 %vm355_vm2, %v4857_v37 }
  0x55   : > { %3802 = vmatprep.mubr.msk.f32.mxu1 %vm355_vm2, %v4616_v59  ;;  %v4891_v45 = vsel %vm941_vm3, %v982_v41, %v983_v57  ;;  %v4902_v13 = vsel %vm941_vm3, %v983_v57, %v985_v42  ;;  %v992_v41 = vrot.slane %v4458_v35, 2  ;;  %v995_v57 = vrot.slane %v4489_v46, 2 }
  0x56   : > { %6194 = vst [vmem:[#allocation41_spill] sm:$0xff] %v4902_v13 }
  0x57   : > { %3853 = vmatmul.mubr.msk.f32.gmra.mxu0 %vm355_vm2, %v4868_v38  ;;  %v988_v38 = vrot.slane %v4417_v20, 2 }
  0x58   : > { %3803 = vmatmul.mubr.msk.f32.gmra.mxu1 %vm355_vm2, %v4619_v1  ;;  %3855 = vmatprep.mubr.msk.f32.mxu0 %vm355_vm2, %v4874_v28 }
  0x59   : > { %3805 = vmatprep.mubr.msk.f32.mxu1 %vm355_vm2, %v4660_v24  ;;  %v4908_v26 = vsel %vm941_vm3, %v987_v50, %v988_v38  ;;  %v4919_v27 = vsel %vm941_vm3, %v988_v38, %v990_v15  ;;  %v997_v50 = vrot.slane %v4506_v53, 2  ;;  %v1000_v38 = vrot.slane %v4541_v0, 2 }
  0x5a   : > { %6195 = vst [vmem:[#allocation42_spill] sm:$0xff] %v4919_v27 }
  0x5b   : > { %3856 = vmatmul.mubr.msk.f32.gmra.mxu0 %vm355_vm2, %v4885_v56  ;;  %v993_v56 = vrot.slane %v4469_v39, 2 }
  0x5c   : > { %3806 = vmatmul.mubr.msk.f32.gmra.mxu1 %vm355_vm2, %v4663_v40  ;;  %3858 = vmatprep.mubr.msk.f32.mxu0 %vm355_vm2, %v4891_v45 }
  0x5d   : > { %3808 = vmatprep.mubr.msk.f32.mxu1 %vm355_vm2, %v4388_v5  ;;  %v4925_v42 = vsel %vm941_vm3, %v992_v41, %v993_v56  ;;  %v4936_v46 = vsel %vm941_vm3, %v993_v56, %v995_v57  ;;  %v1002_v41 = vrot.slane %v4545_v2, 2  ;;  %v1005_v56 = vrot.slane %v4564_v16, 2 }
  0x5e   : > { %6196 = vst [vmem:[#allocation43_spill] sm:$0xff] %v4936_v46 }
  0x5f   : > { %3859 = vmatmul.mubr.msk.f32.gmra.mxu0 %vm355_vm2, %v4902_v13  ;;  %v998_v13 = vrot.slane %v4509_v54, 2 }
  0x60   : > { %3809 = vmatmul.mubr.msk.f32.gmra.mxu1 %vm355_vm2, %v4393_v8  ;;  %3861 = vmatprep.mubr.msk.f32.mxu0 %vm355_vm2, %v4908_v26 }
  0x61   : > { %3811 = vmatprep.mubr.msk.f32.mxu1 %vm355_vm2, %v4414_v19  ;;  %v4942_v15 = vsel %vm941_vm3, %v997_v50, %v998_v13  ;;  %v4953_v0 = vsel %vm941_vm3, %v998_v13, %v1000_v38  ;;  %v1007_v50 = vrot.slane %v4580_v31, 2  ;;  %v1010_v13 = vrot.slane %v4608_v58, 2 }
  0x62   : > { %6197 = vst [vmem:[#allocation44_spill] sm:$0xff] %v4942_v15  ;;  %6198 = vst [vmem:[#allocation45_spill] sm:$0xff] %v4953_v0 }
  0x63   : > { %3862 = vmatmul.mubr.msk.f32.gmra.mxu0 %vm355_vm2, %v4919_v27  ;;  %v1003_v27 = vrot.slane %v4548_v6, 2 }
  0x64   : > { %3812 = vmatmul.mubr.msk.f32.gmra.mxu1 %vm355_vm2, %v4417_v20  ;;  %3864 = vmatprep.mubr.msk.f32.mxu0 %vm355_vm2, %v4925_v42 }
  0x65   : > { %3814 = vmatprep.mubr.msk.f32.mxu1 %vm355_vm2, %v4458_v35  ;;  %v4959_v57 = vsel %vm941_vm3, %v1002_v41, %v1003_v27  ;;  %v4970_v16 = vsel %vm941_vm3, %v1003_v27, %v1005_v56  ;;  %v1012_v41 = vrot.slane %v4624_v11, 2  ;;  %v1015_v27 = vrot.slane %v4657_v63, 2 }
  0x66   : > { %6199 = vst [vmem:[#allocation46_spill] sm:$0xff] %v4959_v57  ;;  %6200 = vst [vmem:[#allocation47_spill] sm:$0xff] %v4970_v16 }
  0x67   : > { %3865 = vmatmul.mubr.msk.f32.gmra.mxu0 %vm355_vm2, %v4936_v46  ;;  %v1008_v46 = vrot.slane %v4583_v32, 2 }
  0x68   : > { %3815 = vmatmul.mubr.msk.f32.gmra.mxu1 %vm355_vm2, %v4469_v39  ;;  %3867 = vmatprep.mubr.msk.f32.mxu0 %vm355_vm2, %v4942_v15 }
  0x69   : > { %3817 = vmatprep.mubr.msk.f32.mxu1 %vm355_vm2, %v4506_v53  ;;  %v4976_v38 = vsel %vm941_vm3, %v1007_v50, %v1008_v46  ;;  %v4987_v58 = vsel %vm941_vm3, %v1008_v46, %v1010_v13  ;;  %v1017_v50 = vrot.slane %v4668_v51, 2  ;;  %v1020_v46 = vrot.slane %v4701_v52, 2  ;;  %v6204_v52 = vld [vmem:[#allocation7_spill] sm:$0xff] }
  0x6b   : > { %3868 = vmatmul.mubr.msk.f32.gmra.mxu0 %vm355_vm2, %v4953_v0  ;;  %v6201_v0 = vld [vmem:[#allocation21_spill] sm:$0xff] }
  0x6c   : > { %3818 = vmatmul.mubr.msk.f32.gmra.mxu1 %vm355_vm2, %v4509_v54  ;;  %3870 = vmatprep.mubr.msk.f32.mxu0 %vm355_vm2, %v4959_v57  ;;  %v1013_v15 = vrot.slane %v6201_v0, 2 }
  0x6d   : > { %3820 = vmatprep.mubr.msk.f32.mxu1 %vm355_vm2, %v4545_v2 }
  0x6e   : > { %v4993_v56 = vsel %vm941_vm3, %v1012_v41, %v1013_v15  ;;  %v5004_v63 = vsel %vm941_vm3, %v1013_v15, %v1015_v27  ;;  %v6205_v41 = vld [vmem:[#allocation9_spill] sm:$0xff] }
  0x6f   : > { %3871 = vmatmul.mubr.msk.f32.gmra.mxu0 %vm355_vm2, %v4970_v16  ;;  %v6202_v16 = vld [vmem:[#allocation26_spill] sm:$0xff]  ;;  %v5045_v27 = vld [vmem:[%s6071_s1 + $0x20] sm:$0xf] }
  0x70   : > { %3821 = vmatmul.mubr.msk.f32.gmra.mxu1 %vm355_vm2, %v4548_v6  ;;  %3873 = vmatprep.mubr.msk.f32.mxu0 %vm355_vm2, %v4976_v38  ;;  %v1018_v57 = vrot.slane %v6202_v16, 2 }
  0x71   : > { %3823 = vmatprep.mubr.msk.f32.mxu1 %vm355_vm2, %v4580_v31 }
  0x72   : > { %v5010_v13 = vsel %vm941_vm3, %v1017_v50, %v1018_v57  ;;  %v5019_v15 = vsel %vm941_vm3, %v1018_v57, %v1020_v46  ;;  %v5036_v57 = vld [vmem:[%s6071_s1 + $0x1c] sm:$0xf]  ;;  %v6210_v50 = vld [vmem:[#allocation19_spill] sm:$0xff]  ;;  %v6211_v46 = vld [vmem:[#allocation22_spill] sm:$0xff] }
  0x73   : > { %3874 = vmatmul.mubr.msk.f32.gmra.mxu0 %vm355_vm2, %v4987_v58  ;;  %6203 = vst [vmem:[#allocation21_spill] sm:$0xff] %v5019_v15 }
  0x74   : > { %3824 = vmatmul.mubr.msk.f32.gmra.mxu1 %vm355_vm2, %v4583_v32  ;;  %3876 = vmatprep.mubr.msk.f32.mxu0 %vm355_vm2, %v4993_v56 }
  0x75   : > { %3826 = vmatprep.mubr.msk.f32.mxu1 %vm355_vm2, %v4624_v11 }
  0x77   : > { %3877 = vmatmul.mubr.msk.f32.gmra.mxu0 %vm355_vm2, %v5004_v63 }
  0x78   : > { %3827 = vmatmul.mubr.msk.f32.gmra.mxu1 %vm355_vm2, %v6201_v0  ;;  %3879 = vmatprep.mubr.msk.f32.mxu0 %vm355_vm2, %v5010_v13 }
  0x79   : > { %3829 = vmatprep.mubr.msk.f32.mxu1 %vm355_vm2, %v4668_v51 }
  0x7b   : > { %3880 = vmatmul.mubr.msk.f32.gmra.mxu0 %vm355_vm2, %v5019_v15 }
  0x7c   : > { %3830 = vmatmul.mubr.msk.f32.gmra.mxu1 %vm355_vm2, %v6202_v16  ;;  %3934 = vmatprep.mubr.msk.f32.mxu0 %vm355_vm2, %v6204_v52  ;;  %v6212_v52 = vld [vmem:[#allocation24_spill] sm:$0xff] }
  0x7d   : > { %3884 = vmatprep.mubr.msk.f32.mxu1 %vm355_vm2, %v4405_v14  ;;  %v6206_v14 = vld [vmem:[#allocation11_spill] sm:$0xff] }
  0x7f   : > { %3935 = vmatmul.mubr.msk.f32.vlgmr.msra.gmra.mxu0 %vm355_vm2, %v6205_v41  ;;  %v6213_v41 = vld [vmem:[#allocation27_spill] sm:$0xff] }
  0x80   : > { %3885 = vmatmul.mubr.msk.f32.vlgmr.msra.gmra.mxu1 %vm355_vm2, %v4410_v17  ;;  %4033 = vmatpush3.msk.msra.mxu0 %vm420_vm0, %v4776_v23  ;;  %v6207_v17 = vld [vmem:[#allocation13_spill] sm:$0xff]  ;;  %v6208_v23 = vld [vmem:[#allocation15_spill] sm:$0xff] }
  0x81   : > { %3983 = vmatpush3.msk.msra.mxu1 %vm420_vm0, %v4763_v9  ;;  %3887 = vmatprep.mubr.msk.f32.mxu1 %vm355_vm2, %v4452_v33  ;;  %v6209_v9 = vld [vmem:[#allocation17_spill] sm:$0xff] }
  0x82   : > { %3937 = vmatprep.mubr.msk.f32.mxu0 %vm355_vm2, %v6206_v14  ;;  %4082 = vmatprep.subr.msk.mxu1 %vm420_vm0, %v5036_v57 }
  0x83   : > { %3938 = vmatmul.mubr.msk.f32.gmra.mxu0 %vm355_vm2, %v6207_v17  ;;  %4132 = vmatprep.subr.msk.mxu0 %vm420_vm0, %v5045_v27 }
  0x84   : > { %3888 = vmatmul.mubr.msk.f32.gmra.mxu1 %vm355_vm2, %v4455_v34  ;;  %3940 = vmatprep.mubr.msk.f32.mxu0 %vm355_vm2, %v6208_v23 }
  0x85   : > { %3890 = vmatprep.mubr.msk.f32.mxu1 %vm355_vm2, %v4492_v47 }
  0x87   : > { %3941 = vmatmul.mubr.msk.f32.gmra.mxu0 %vm355_vm2, %v6209_v9 }
  0x88   : > { %3891 = vmatmul.mubr.msk.f32.gmra.mxu1 %vm355_vm2, %v4495_v48  ;;  %3943 = vmatprep.mubr.msk.f32.mxu0 %vm355_vm2, %v6210_v50  ;;  %v6214_v50 = vld [vmem:[#allocation29_spill] sm:$0xff] }
  0x89   : > { %3893 = vmatprep.mubr.msk.f32.mxu1 %vm355_vm2, %v4512_v55 }
  0x8b   : > { %3944 = vmatmul.mubr.msk.f32.gmra.mxu0 %vm355_vm2, %v6211_v46 }
  0x8c   : > { %3894 = vmatmul.mubr.msk.f32.gmra.mxu1 %vm355_vm2, %v4528_v61  ;;  %3946 = vmatprep.mubr.msk.f32.mxu0 %vm355_vm2, %v6212_v52  ;;  %v5162_v52 = vld [vmem:[%s4379_s7 + $0x190] sm:$0x3] }
  0x8d   : > { %3896 = vmatprep.mubr.msk.f32.mxu1 %vm355_vm2, %v4572_v25 }
  0x8f   : > { %3947 = vmatmul.mubr.msk.f32.gmra.mxu0 %vm355_vm2, %v6213_v41  ;;  %v5149_v41 = vld [vmem:[%s4379_s7 + $0x188] sm:$0xff] }
  0x90   : > { %3897 = vmatmul.mubr.msk.f32.gmra.mxu1 %vm355_vm2, %v4575_v30  ;;  %3949 = vmatprep.mubr.msk.f32.mxu0 %vm355_vm2, %v6214_v50  ;;  %v6215_v50 = vld [vmem:[#allocation5_spill] sm:$0xff] }
  0x91   : > { %3899 = vmatprep.mubr.msk.f32.mxu1 %vm355_vm2, %v4616_v59 }
  0x93   : > { %3950 = vmatmul.mubr.msk.f32.gmra.mxu0 %vm355_vm2, %v4710_v22  ;;  %v6216_v22 = vld [vmem:[#allocation6_spill] sm:$0xff] }
  0x94   : > { %3900 = vmatmul.mubr.msk.f32.gmra.mxu1 %vm355_vm2, %v4619_v1  ;;  %3952 = vmatprep.mubr.msk.f32.mxu0 %vm355_vm2, %v4720_v7  ;;  %v6217_v7 = vld [vmem:[#allocation8_spill] sm:$0xff] }
  0x95   : > { %3902 = vmatprep.mubr.msk.f32.mxu1 %vm355_vm2, %v4660_v24 }
  0x97   : > { %3953 = vmatmul.mubr.msk.f32.gmra.mxu0 %vm355_vm2, %v4735_v29  ;;  %v6218_v29 = vld [vmem:[#allocation10_spill] sm:$0xff] }
  0x98   : > { %3903 = vmatmul.mubr.msk.f32.gmra.mxu1 %vm355_vm2, %v4663_v40  ;;  %3955 = vmatprep.mubr.msk.f32.mxu0 %vm355_vm2, %v6215_v50  ;;  %v6219_v50 = vld [vmem:[#allocation12_spill] sm:$0xff] }
  0x99   : > { %3905 = vmatprep.mubr.msk.f32.mxu1 %vm355_vm2, %v4388_v5 }
  0x9b   : > { %3956 = vmatmul.mubr.msk.f32.gmra.mxu0 %vm355_vm2, %v6216_v22  ;;  %v6220_v22 = vld [vmem:[#allocation14_spill] sm:$0xff] }
  0x9c   : > { %3906 = vmatmul.mubr.msk.f32.gmra.mxu1 %vm355_vm2, %v4393_v8  ;;  %3958 = vmatprep.mubr.msk.f32.mxu0 %vm355_vm2, %v6217_v7  ;;  %v6221_v7 = vld [vmem:[#allocation16_spill] sm:$0xff] }
  0x9d   : > { %3908 = vmatprep.mubr.msk.f32.mxu1 %vm355_vm2, %v4414_v19 }
  0x9f   : > { %3959 = vmatmul.mubr.msk.f32.gmra.mxu0 %vm355_vm2, %v6218_v29  ;;  %v6222_v29 = vld [vmem:[#allocation18_spill] sm:$0xff] }
  0xa0   : > { %3909 = vmatmul.mubr.msk.f32.gmra.mxu1 %vm355_vm2, %v4417_v20  ;;  %3961 = vmatprep.mubr.msk.f32.mxu0 %vm355_vm2, %v6219_v50  ;;  %v6223_v50 = vld [vmem:[#allocation20_spill] sm:$0xff] }
  0xa1   : > { %3911 = vmatprep.mubr.msk.f32.mxu1 %vm355_vm2, %v4458_v35 }
  0xa3   : > { %3962 = vmatmul.mubr.msk.f32.gmra.mxu0 %vm355_vm2, %v6220_v22  ;;  %v6224_v22 = vld [vmem:[#allocation23_spill] sm:$0xff] }
  0xa4   : > { %3912 = vmatmul.mubr.msk.f32.gmra.mxu1 %vm355_vm2, %v4469_v39  ;;  %3964 = vmatprep.mubr.msk.f32.mxu0 %vm355_vm2, %v6221_v7  ;;  %v6225_v7 = vld [vmem:[#allocation25_spill] sm:$0xff] }
  0xa5   : > { %3914 = vmatprep.mubr.msk.f32.mxu1 %vm355_vm2, %v4506_v53 }
  0xa7   : > { %3965 = vmatmul.mubr.msk.f32.gmra.mxu0 %vm355_vm2, %v6222_v29  ;;  %v5146_v29 = vld [vmem:[%s4379_s7 + $0x180] sm:$0xff] }
  0xa8   : > { %3915 = vmatmul.mubr.msk.f32.gmra.mxu1 %vm355_vm2, %v4509_v54  ;;  %3967 = vmatprep.mubr.msk.f32.mxu0 %vm355_vm2, %v6223_v50  ;;  %v6226_v50 = vld [vmem:[#allocation28_spill] sm:$0xff] }
  0xa9   : > { %3917 = vmatprep.mubr.msk.f32.mxu1 %vm355_vm2, %v4545_v2 }
  0xab   : > { %3968 = vmatmul.mubr.msk.f32.gmra.mxu0 %vm355_vm2, %v6224_v22  ;;  %v1618_v22 = vrot.slane %v5149_v41, 1 }
  0xac   : > { %3918 = vmatmul.mubr.msk.f32.gmra.mxu1 %vm355_vm2, %v4548_v6  ;;  %3970 = vmatprep.mubr.msk.f32.mxu0 %vm355_vm2, %v6225_v7  ;;  %v1617_v7 = vrot.slane %v5146_v29, 1 }
  0xad   : > { %3920 = vmatprep.mubr.msk.f32.mxu1 %vm355_vm2, %v4580_v31 }
  0xaf   : > { %3971 = vmatmul.mubr.msk.f32.gmra.mxu0 %vm355_vm2, %v6226_v50  ;;  %v5174_v50 = vsel %vm272_vm1, %v1617_v7, %v1618_v22 }
  0xb0   : > { %3921 = vmatmul.mubr.msk.f32.gmra.mxu1 %vm355_vm2, %v4583_v32  ;;  %3973 = vmatprep.mubr.msk.f32.mxu0 %vm355_vm2, %v4696_v44  ;;  %v1620_v44 = vrot.slane %v5162_v52, 1  ;;  %6227 = vst [vmem:[#allocation26_spill] sm:$0xff] %v5174_v50 }
  0xb1   : > { %3923 = vmatprep.mubr.msk.f32.mxu1 %vm355_vm2, %v4624_v11 }
  0xb3   : > { %3974 = vmatmul.mubr.msk.f32.gmra.mxu0 %vm355_vm2, %v4717_v62  ;;  %v5183_v62 = vsel %vm272_vm1, %v1618_v22, %v1620_v44  ;;  %v6239_v22 = vld [vmem:[#allocation47_spill] sm:$0xff] }
  0xb4   : > { %3924 = vmatmul.mubr.msk.f32.gmra.mxu1 %vm355_vm2, %v6201_v0  ;;  %3976 = vmatprep.mubr.msk.f32.mxu0 %vm355_vm2, %v4725_v43  ;;  %6228 = vst [vmem:[#allocation7_spill] sm:$0xff] %v5183_v62 }
  0xb5   : > { %3926 = vmatprep.mubr.msk.f32.mxu1 %vm355_vm2, %v4668_v51 }
  0xb7   : > { %3977 = vmatmul.mubr.msk.f32.gmra.mxu0 %vm355_vm2, %v4740_v36  ;;  %v5360_v36 = vld [vmem:[%s4379_s7 + $0x198] sm:$0xff] }
  0xb8   : > { %3927 = vmatmul.mubr.msk.f32.gmra.mxu1 %vm355_vm2, %v6202_v16  ;;  %3979 = vmatprep.mubr.msk.f32.mxu0 %vm355_vm2, %v5174_v50 }
  0xb9   : > { %3929 = vmatprep.mubr.msk.f32.mxu1 %vm355_vm2, %v5146_v29 }
  0xbb   : > { %3980 = vmatmul.mubr.msk.f32.gmra.mxu0 %vm355_vm2, %v5183_v62 }
  0xbc   : > { %3930 = vmatmul.mubr.msk.f32.gmra.mxu1 %vm355_vm2, %v5149_v41  ;;  %4034 = vmatprep.mubr.msk.f32.mxu0 %vm355_vm2, %v4452_v33  ;;  %v6229_v33 = vld [vmem:[#allocation37_spill] sm:$0xff] }
  0xbd   : > { %3984 = vmatprep.mubr.msk.f32.mxu1 %vm355_vm2, %v4758_v18 }
  0xbf   : > { %4035 = vmatmul.mubr.msk.f32.vlgmr.msra.gmra.mxu0 %vm355_vm2, %v4455_v34  ;;  %v6230_v34 = vld [vmem:[#allocation38_spill] sm:$0xff] }
  0xc0   : > { %3985 = vmatmul.mubr.msk.f32.vlgmr.msra.gmra.mxu1 %vm355_vm2, %v4770_v3  ;;  %4133 = vmatpush3.msk.msra.mxu0 %vm420_vm0, %v5045_v27 }
  0xc1   : > { %4083 = vmatpush3.msk.msra.mxu1 %vm420_vm0, %v5036_v57  ;;  %3987 = vmatprep.mubr.msk.f32.mxu1 %vm355_vm2, %v4783_v4  ;;  %v1888_v57 = vrot.slane %v5146_v29, 2 }
  0xc2   : > { %4037 = vmatprep.mubr.msk.f32.mxu0 %vm355_vm2, %v4492_v47  ;;  %v6231_v47 = vld [vmem:[#allocation39_spill] sm:$0xff] }
  0xc3   : > { %4038 = vmatmul.mubr.msk.f32.gmra.mxu0 %vm355_vm2, %v4495_v48  ;;  %v6232_v48 = vld [vmem:[#allocation40_spill] sm:$0xff] }
  0xc4   : > { %3988 = vmatmul.mubr.msk.f32.gmra.mxu1 %vm355_vm2, %v4800_v21  ;;  %4040 = vmatprep.mubr.msk.f32.mxu0 %vm355_vm2, %v4512_v55  ;;  %v6233_v55 = vld [vmem:[#allocation41_spill] sm:$0xff] }
  0xc5   : > { %3990 = vmatprep.mubr.msk.f32.mxu1 %vm355_vm2, %v4806_v10 }
  0xc7   : > { %4041 = vmatmul.mubr.msk.f32.gmra.mxu0 %vm355_vm2, %v4528_v61 }
  0xc8   : > { %3991 = vmatmul.mubr.msk.f32.gmra.mxu1 %vm355_vm2, %v4817_v60  ;;  %4043 = vmatprep.mubr.msk.f32.mxu0 %vm355_vm2, %v4572_v25  ;;  %v6235_v25 = vld [vmem:[#allocation43_spill] sm:$0xff] }
  0xc9   : > { %3993 = vmatprep.mubr.msk.f32.mxu1 %vm355_vm2, %v4823_v49 }
  0xcb   : > { %4044 = vmatmul.mubr.msk.f32.gmra.mxu0 %vm355_vm2, %v4575_v30  ;;  %v6236_v30 = vld [vmem:[#allocation44_spill] sm:$0xff] }
  0xcc   : > { %3994 = vmatmul.mubr.msk.f32.gmra.mxu1 %vm355_vm2, %v6229_v33  ;;  %4046 = vmatprep.mubr.msk.f32.mxu0 %vm355_vm2, %v4616_v59 }
  0xcd   : > { %3996 = vmatprep.mubr.msk.f32.mxu1 %vm355_vm2, %v4840_v12 }
  0xcf   : > { %4047 = vmatmul.mubr.msk.f32.gmra.mxu0 %vm355_vm2, %v4619_v1 }
  0xd0   : > { %3997 = vmatmul.mubr.msk.f32.gmra.mxu1 %vm355_vm2, %v6230_v34  ;;  %4049 = vmatprep.mubr.msk.f32.mxu0 %vm355_vm2, %v4660_v24  ;;  %v6237_v24 = vld [vmem:[#allocation45_spill] sm:$0xff] }
  0xd1   : > { %3999 = vmatprep.mubr.msk.f32.mxu1 %vm355_vm2, %v4857_v37 }
  0xd3   : > { %4050 = vmatmul.mubr.msk.f32.gmra.mxu0 %vm355_vm2, %v4663_v40  ;;  %v6238_v40 = vld [vmem:[#allocation46_spill] sm:$0xff] }
  0xd4   : > { %4000 = vmatmul.mubr.msk.f32.gmra.mxu1 %vm355_vm2, %v6231_v47  ;;  %4052 = vmatprep.mubr.msk.f32.mxu0 %vm355_vm2, %v4388_v5 }
  0xd5   : > { %4002 = vmatprep.mubr.msk.f32.mxu1 %vm355_vm2, %v4874_v28 }
  0xd7   : > { %4053 = vmatmul.mubr.msk.f32.gmra.mxu0 %vm355_vm2, %v4393_v8 }
  0xd8   : > { %4003 = vmatmul.mubr.msk.f32.gmra.mxu1 %vm355_vm2, %v6232_v48  ;;  %4055 = vmatprep.mubr.msk.f32.mxu0 %vm355_vm2, %v4414_v19  ;;  %v6234_v19 = vld [vmem:[#allocation42_spill] sm:$0xff] }
  0xd9   : > { %4005 = vmatprep.mubr.msk.f32.mxu1 %vm355_vm2, %v4891_v45 }
  0xdb   : > { %4056 = vmatmul.mubr.msk.f32.gmra.mxu0 %vm355_vm2, %v4417_v20 }
  0xdc   : > { %4006 = vmatmul.mubr.msk.f32.gmra.mxu1 %vm355_vm2, %v6233_v55  ;;  %4058 = vmatprep.mubr.msk.f32.mxu0 %vm355_vm2, %v4458_v35 }
  0xdd   : > { %4008 = vmatprep.mubr.msk.f32.mxu1 %vm355_vm2, %v4908_v26 }
  0xdf   : > { %v5263_v5 = vpop.f32.mrf.mxu0  ;;  %4059 = vmatmul.mubr.msk.f32.gmra.mxu0 %vm355_vm2, %v4469_v39 }
  0xe0   : > { %v5267_v8 = vpop.f32.mrf.mxu1  ;;  %4009 = vmatmul.mubr.msk.f32.gmra.mxu1 %vm355_vm2, %v6234_v19  ;;  %4061 = vmatprep.mubr.msk.f32.mxu0 %vm355_vm2, %v4506_v53 }
  0xe1   : > { %v5273_v20 = vpop.f32.mrf.mxu0  ;;  %4011 = vmatprep.mubr.msk.f32.mxu1 %vm355_vm2, %v4925_v42 }
  0xe2   : > { %v5277_v35 = vpop.f32.mrf.mxu1 }
  0xe3   : > { %v5279_v61 = vpop.f32.mrf.mxu0  ;;  %4062 = vmatmul.mubr.msk.f32.gmra.mxu0 %vm355_vm2, %v4509_v54 }
  0xe4   : > { %v5283_v39 = vpop.f32.mrf.mxu1  ;;  %4012 = vmatmul.mubr.msk.f32.gmra.mxu1 %vm355_vm2, %v6235_v25  ;;  %4064 = vmatprep.mubr.msk.f32.mxu0 %vm355_vm2, %v4545_v2 }
  0xe5   : > { %v5289_v53 = vpop.f32.mrf.mxu0  ;;  %4014 = vmatprep.mubr.msk.f32.mxu1 %vm355_vm2, %v6236_v30 }
  0xe6   : > { %v5293_v59 = vpop.f32.mrf.mxu1 }
  0xe7   : > { %v5295_v1 = vpop.f32.mrf.mxu0  ;;  %4065 = vmatmul.mubr.msk.f32.gmra.mxu0 %vm355_vm2, %v4548_v6 }
  0xe8   : > { %v5299_v54 = vpop.f32.mrf.mxu1  ;;  %4015 = vmatmul.mubr.msk.f32.gmra.mxu1 %vm355_vm2, %v6237_v24  ;;  %4067 = vmatprep.mubr.msk.f32.mxu0 %vm355_vm2, %v4580_v31 }
  0xe9   : > { %v5305_v2 = vpop.f32.mrf.mxu0  ;;  %4017 = vmatprep.mubr.msk.f32.mxu1 %vm355_vm2, %v6238_v40 }
  0xea   : > { %v5309_v7 = vpop.f32.mrf.mxu1 }
  0xeb   : > { %v5311_v44 = vpop.f32.mrf.mxu0  ;;  %4068 = vmatmul.mubr.msk.f32.gmra.mxu0 %vm355_vm2, %v4583_v32 }
  0xec   : > { %v5315_v6 = vpop.f32.mrf.mxu1  ;;  %4018 = vmatmul.mubr.msk.f32.gmra.mxu1 %vm355_vm2, %v6239_v22  ;;  %4070 = vmatprep.mubr.msk.f32.mxu0 %vm355_vm2, %v4624_v11 }
  0xed   : > { %v5321_v31 = vpop.f32.mrf.mxu0  ;;  %4020 = vmatprep.mubr.msk.f32.mxu1 %vm355_vm2, %v4976_v38 }
  0xee   : > { %v5325_v18 = vpop.f32.mrf.mxu1 }
  0xef   : > { %v5327_v3 = vpop.f32.mrf.mxu0  ;;  %4071 = vmatmul.mubr.msk.f32.gmra.mxu0 %vm355_vm2, %v6201_v0  ;;  %v1889_v0 = vrot.slane %v5149_v41, 2 }
  0xf0   : > { %v5331_v32 = vpop.f32.mrf.mxu1  ;;  %4021 = vmatmul.mubr.msk.f32.gmra.mxu1 %vm355_vm2, %v4987_v58  ;;  %4073 = vmatprep.mubr.msk.f32.mxu0 %vm355_vm2, %v4668_v51 }
  0xf1   : > { %6240 = vst [vmem:[#allocation9_spill] sm:$0xff] %v5331_v32  ;;  %v5337_v11 = vpop.f32.mrf.mxu0  ;;  %4023 = vmatprep.mubr.msk.f32.mxu1 %vm355_vm2, %v4993_v56  ;;  %v5379_v32 = vld [vmem:[%s4379_s7 + $0x1a0] sm:$0xff] }
  0xf2   : > { %v5342_v27 = vpop.f32.mrf.mxu1 }
  0xf3   : > { %6241 = vst [vmem:[#allocation11_spill] sm:$0xff] %v5342_v27  ;;  %v5345_v62 = vpop.f32.mrf.mxu0  ;;  %4074 = vmatmul.mubr.msk.f32.gmra.mxu0 %vm355_vm2, %v6202_v16  ;;  %v1891_v27 = vrot.slane %v5162_v52, 2  ;;  %v5366_v16 = vsel %vm941_vm3, %v1888_v57, %v1889_v0 }
  0xf4   : > { %v5349_v50 = vpop.f32.mrf.mxu1  ;;  %4024 = vmatmul.mubr.msk.f32.gmra.mxu1 %vm355_vm2, %v5004_v63  ;;  %4076 = vmatprep.mubr.msk.f32.mxu0 %vm355_vm2, %v5146_v29  ;;  %6244 = vst [vmem:[#allocation17_spill] sm:$0xff] %v5366_v16 }
  0xf5   : > { %6242 = vst [vmem:[#allocation13_spill] sm:$0xff] %v5349_v50  ;;  %v5355_v51 = vpop.f32.mrf.mxu0  ;;  %4026 = vmatprep.mubr.msk.f32.mxu1 %vm355_vm2, %v5010_v13  ;;  %v5386_v57 = vsel %vm941_vm3, %v1889_v0, %v1891_v27 }
  0xf6   : > { %v5363_v43 = vpop.f32.mrf.mxu1  ;;  %6246 = vst [vmem:[#allocation37_spill] sm:$0xff] %v5386_v57 }
  0xf7   : > { %6243 = vst [vmem:[#allocation15_spill] sm:$0xff] %v5363_v43  ;;  %v5368_v50 = vpop.f32.mrf.mxu0  ;;  %4077 = vmatmul.mubr.msk.f32.gmra.mxu0 %vm355_vm2, %v5149_v41 }
  0xf8   : > { %v5372_v29 = vpop.f32.mrf.mxu1  ;;  %4027 = vmatmul.mubr.msk.f32.gmra.mxu1 %vm355_vm2, %v5019_v15  ;;  %4079 = vmatprep.mubr.msk.f32.mxu0 %vm355_vm2, %v5360_v36 }
  0xf9   : > { %6245 = vst [vmem:[#allocation22_spill] sm:$0xff] %v5372_v29  ;;  %v5381_v52 = vpop.f32.mrf.mxu0  ;;  %4029 = vmatprep.mubr.msk.f32.mxu1 %vm355_vm2, %v5366_v16 }
  0xfa   : > { %v5388_v43 = vpop.f32.mrf.mxu1 }
  0xfb   : > { %6247 = vst [vmem:[#allocation38_spill] sm:$0xff] %v5388_v43  ;;  %v5390_v41 = vpop.f32.mrf.mxu0  ;;  %4080 = vmatmul.mubr.msk.f32.gmra.mxu0 %vm355_vm2, %v5379_v32 }
  0xfc   : > { %v5394_v29 = vpop.f32.mrf.mxu1  ;;  %4030 = vmatmul.mubr.msk.f32.gmra.mxu1 %vm355_vm2, %v5386_v57  ;;  %4134 = vmatprep.mubr.msk.f32.mxu0 %vm355_vm2, %v4783_v4 }
  0xfd   : > { %6248 = vst [vmem:[#allocation39_spill] sm:$0xff] %v5394_v29  ;;  %v5400_v15 = vpop.f32.mrf.mxu0  ;;  %4084 = vmatprep.mubr.msk.f32.mxu1 %vm355_vm2, %v6206_v14 }
  0xfe   : > { %v5404_v27 = vpop.f32.mrf.mxu1 }
  0xff   : > { %6249 = vst [vmem:[#allocation40_spill] sm:$0xff] %v5404_v27  ;;  %v3836_v0 = vpop.f32.mrf.mxu0  ;;  %4135 = vmatmul.mubr.msk.f32.vlgmr.msra.gmra.mxu0 %vm355_vm2, %v4800_v21 }
 0x100   : > { %v3786_v43 = vpop.f32.mrf.mxu1  ;;  %4085 = vmatmul.mubr.msk.f32.vlgmr.msra.gmra.mxu1 %vm355_vm2, %v6207_v17  ;;  %4137 = vmatprep.mubr.msk.f32.mxu0 %vm355_vm2, %v4806_v10 }
 0x101   : > { %v788_v4 = vadd.f32 %v3786_v43, %v5263_v5  ;;  %v1157_v29 = vpop.f32.mrf.mxu0  ;;  %4087 = vmatprep.mubr.msk.f32.mxu1 %vm355_vm2, %v6208_v23  ;;  %v6250_v23 = vld [vmem:[#allocation19_spill] sm:$0xff] }
 0x102   : > { %v782_v14 = vpop.f32.mrf.mxu1 }
 0x103   : > { %v5415_v57 = vadd.f32 %v3836_v0, %v788_v4  ;;  %v783_v27 = vadd.f32 %v782_v14, %v5273_v20  ;;  %v3839_v16 = vpop.f32.mrf.mxu0  ;;  %4138 = vmatmul.mubr.msk.f32.gmra.mxu0 %vm355_vm2, %v4817_v60  ;;  %v6252_v14 = vld [vmem:[#allocation27_spill] sm:$0xff] }
 0x104   : > { %v3789_v21 = vpop.f32.mrf.mxu1  ;;  %4088 = vmatmul.mubr.msk.f32.gmra.mxu1 %vm355_vm2, %v6209_v9  ;;  %4140 = vmatprep.mubr.msk.f32.mxu0 %vm355_vm2, %v4823_v49 }
 0x105   : > { %v5424_v43 = vadd.f32 %v1157_v29, %v783_v27  ;;  %v798_v10 = vadd.f32 %v3789_v21, %v5279_v61  ;;  %v1167_v17 = vpop.f32.mrf.mxu0  ;;  %4090 = vmatprep.mubr.msk.f32.mxu1 %vm355_vm2, %v6250_v23 }
 0x106   : > { %v792_v5 = vpop.f32.mrf.mxu1 }
 0x107   : > { %v5429_v20 = vadd.f32 %v3839_v16, %v798_v10  ;;  %v793_v60 = vadd.f32 %v792_v5, %v5289_v53  ;;  %v3842_v0 = vpop.f32.mrf.mxu0  ;;  %4141 = vmatmul.mubr.msk.f32.gmra.mxu0 %vm355_vm2, %v6229_v33  ;;  %v6251_v16 = vld [vmem:[#allocation24_spill] sm:$0xff]  ;;  %v6253_v10 = vld [vmem:[#allocation29_spill] sm:$0xff] }
 0x108   : > { %v3792_v9 = vpop.f32.mrf.mxu1  ;;  %4091 = vmatmul.mubr.msk.f32.gmra.mxu1 %vm355_vm2, %v6211_v46  ;;  %4143 = vmatprep.mubr.msk.f32.mxu0 %vm355_vm2, %v4840_v12 }
 0x109   : > { %v5438_v49 = vadd.f32 %v1167_v17, %v793_v60  ;;  %v808_v61 = vadd.f32 %v3792_v9, %v5295_v1  ;;  %v1177_v29 = vpop.f32.mrf.mxu0  ;;  %4093 = vmatprep.mubr.msk.f32.mxu1 %vm355_vm2, %v6251_v16  ;;  %v6254_v60 = vld [vmem:[#allocation31_spill] sm:$0xff]  ;;  %v6255_v9 = vld [vmem:[#allocation33_spill] sm:$0xff] }
 0x10a   : > { %v802_v53 = vpop.f32.mrf.mxu1 }
 0x10b   : > { %v5443_v27 = vadd.f32 %v3842_v0, %v808_v61  ;;  %v803_v33 = vadd.f32 %v802_v53, %v5305_v2  ;;  %v3845_v4 = vpop.f32.mrf.mxu0  ;;  %4144 = vmatmul.mubr.msk.f32.gmra.mxu0 %vm355_vm2, %v6230_v34  ;;  %v6256_v53 = vld [vmem:[#allocation35_spill] sm:$0xff] }
 0x10c   : > { %v3795_v46 = vpop.f32.mrf.mxu1  ;;  %4094 = vmatmul.mubr.msk.f32.gmra.mxu1 %vm355_vm2, %v6252_v14  ;;  %4146 = vmatprep.mubr.msk.f32.mxu0 %vm355_vm2, %v4857_v37 }
 0x10d   : > { %v5452_v12 = vadd.f32 %v1177_v29, %v803_v33  ;;  %v818_v1 = vadd.f32 %v3795_v46, %v5311_v44  ;;  %v1187_v21 = vpop.f32.mrf.mxu0  ;;  %4096 = vmatprep.mubr.msk.f32.mxu1 %vm355_vm2, %v6253_v10 }
 0x10e   : > { %v812_v2 = vpop.f32.mrf.mxu1 }
 0x10f   : > { %v5457_v17 = vadd.f32 %v3845_v4, %v818_v1  ;;  %v813_v34 = vadd.f32 %v812_v2, %v5321_v31  ;;  %v3848_v23 = vpop.f32.mrf.mxu0  ;;  %4147 = vmatmul.mubr.msk.f32.gmra.mxu0 %vm355_vm2, %v6231_v47  ;;  %v6257_v4 = vld [vmem:[#allocation5_spill] sm:$0xff]  ;;  %v6259_v2 = vld [vmem:[#allocation8_spill] sm:$0xff] }
 0x110   : > { %v3798_v5 = vpop.f32.mrf.mxu1  ;;  %4097 = vmatmul.mubr.msk.f32.gmra.mxu1 %vm355_vm2, %v6254_v60  ;;  %4149 = vmatprep.mubr.msk.f32.mxu0 %vm355_vm2, %v4874_v28  ;;  %v6260_v60 = vld [vmem:[#allocation10_spill] sm:$0xff] }
 0x111   : > { %v5466_v37 = vadd.f32 %v1187_v21, %v813_v34  ;;  %v828_v44 = vadd.f32 %v3798_v5, %v5327_v3  ;;  %v1197_v0 = vpop.f32.mrf.mxu0  ;;  %4099 = vmatprep.mubr.msk.f32.mxu1 %vm355_vm2, %v6255_v9  ;;  %v6258_v21 = vld [vmem:[#allocation6_spill] sm:$0xff] }
 0x112   : > { %v822_v31 = vpop.f32.mrf.mxu1 }
 0x113   : > { %v5471_v61 = vadd.f32 %v3848_v23, %v828_v44  ;;  %v823_v47 = vadd.f32 %v822_v31, %v5337_v11  ;;  %v3851_v29 = vpop.f32.mrf.mxu0  ;;  %4150 = vmatmul.mubr.msk.f32.gmra.mxu0 %vm355_vm2, %v6232_v48 }
 0x114   : > { %v3801_v16 = vpop.f32.mrf.mxu1  ;;  %4100 = vmatmul.mubr.msk.f32.gmra.mxu1 %vm355_vm2, %v6256_v53  ;;  %4152 = vmatprep.mubr.msk.f32.mxu0 %vm355_vm2, %v4891_v45  ;;  %v6263_v53 = vld [vmem:[#allocation16_spill] sm:$0xff] }
 0x115   : > { %v5480_v28 = vadd.f32 %v1197_v0, %v823_v47  ;;  %v838_v3 = vadd.f32 %v3801_v16, %v5345_v62  ;;  %v1207_v33 = vpop.f32.mrf.mxu0  ;;  %4102 = vmatprep.mubr.msk.f32.mxu1 %vm355_vm2, %v6257_v4  ;;  %v6261_v0 = vld [vmem:[#allocation12_spill] sm:$0xff] }
 0x116   : > { %v832_v11 = vpop.f32.mrf.mxu1 }
 0x117   : > { %v5485_v46 = vadd.f32 %v3851_v29, %v838_v3  ;;  %v833_v48 = vadd.f32 %v832_v11, %v5355_v51  ;;  %v3854_v14 = vpop.f32.mrf.mxu0  ;;  %4153 = vmatmul.mubr.msk.f32.gmra.mxu0 %vm355_vm2, %v6233_v55  ;;  %v6262_v29 = vld [vmem:[#allocation14_spill] sm:$0xff] }
 0x118   : > { %v3804_v1 = vpop.f32.mrf.mxu1  ;;  %4103 = vmatmul.mubr.msk.f32.gmra.mxu1 %vm355_vm2, %v6258_v21  ;;  %4155 = vmatprep.mubr.msk.f32.mxu0 %vm355_vm2, %v4908_v26  ;;  %v6264_v11 = vld [vmem:[#allocation18_spill] sm:$0xff] }
 0x119   : > { %v5494_v62 = vadd.f32 %v1207_v33, %v833_v48  ;;  %v848_v45 = vadd.f32 %v3804_v1, %v5368_v50  ;;  %v1217_v10 = vpop.f32.mrf.mxu0  ;;  %4105 = vmatprep.mubr.msk.f32.mxu1 %vm355_vm2, %v6259_v2 }
 0x11a   : > { %v842_v51 = vpop.f32.mrf.mxu1 }
 0x11b   : > { %v5499_v34 = vadd.f32 %v3854_v14, %v848_v45  ;;  %v843_v55 = vadd.f32 %v842_v51, %v5381_v52  ;;  %v3857_v23 = vpop.f32.mrf.mxu0  ;;  %4156 = vmatmul.mubr.msk.f32.gmra.mxu0 %vm355_vm2, %v6234_v19  ;;  %v6265_v14 = vld [vmem:[#allocation20_spill] sm:$0xff]  ;;  %v6267_v51 = vld [vmem:[#allocation25_spill] sm:$0xff] }
 0x11c   : > { %v3807_v5 = vpop.f32.mrf.mxu1  ;;  %4106 = vmatmul.mubr.msk.f32.gmra.mxu1 %vm355_vm2, %v6260_v60  ;;  %4158 = vmatprep.mubr.msk.f32.mxu0 %vm355_vm2, %v4925_v42  ;;  %v6268_v60 = vld [vmem:[#allocation28_spill] sm:$0xff] }
 0x11d   : > { %v5508_v26 = vadd.f32 %v1217_v10, %v843_v55  ;;  %v858_v50 = vadd.f32 %v3807_v5, %v5390_v41  ;;  %v1227_v44 = vpop.f32.mrf.mxu0  ;;  %4108 = vmatprep.mubr.msk.f32.mxu1 %vm355_vm2, %v6261_v0  ;;  %v6266_v10 = vld [vmem:[#allocation23_spill] sm:$0xff] }
 0x11e   : > { %v852_v52 = vpop.f32.mrf.mxu1 }
 0x11f   : > { %v5513_v9 = vadd.f32 %v3857_v23, %v858_v50  ;;  %v853_v19 = vadd.f32 %v852_v52, %v5400_v15  ;;  %v3860_v31 = vpop.f32.mrf.mxu0  ;;  %4159 = vmatmul.mubr.msk.f32.gmra.mxu0 %vm355_vm2, %v6235_v25 }
 0x120   : > { %v3810_v47 = vpop.f32.mrf.mxu1  ;;  %4109 = vmatmul.mubr.msk.f32.gmra.mxu1 %vm355_vm2, %v6262_v29  ;;  %4161 = vmatprep.mubr.msk.f32.mxu0 %vm355_vm2, %v6236_v30  ;;  %v6271_v29 = vld [vmem:[#allocation9_spill] sm:$0xff] }
 0x121   : > { %v5522_v42 = vadd.f32 %v1227_v44, %v853_v19  ;;  %v868_v41 = vadd.f32 %v3810_v47, %v5267_v8  ;;  %v1237_v16 = vpop.f32.mrf.mxu0  ;;  %4111 = vmatprep.mubr.msk.f32.mxu1 %vm355_vm2, %v6263_v53  ;;  %v6269_v44 = vld [vmem:[#allocation30_spill] sm:$0xff]  ;;  %v2428_v53 = vrot.slane %v5360_v36, 1 }
 0x122   : > { %v862_v15 = vpop.f32.mrf.mxu1 }
 0x123   : > { %v5527_v3 = vadd.f32 %v3860_v31, %v868_v41  ;;  %v863_v25 = vadd.f32 %v862_v15, %v5277_v35  ;;  %v3863_v33 = vpop.f32.mrf.mxu0  ;;  %4162 = vmatmul.mubr.msk.f32.gmra.mxu0 %vm355_vm2, %v6237_v24  ;;  %v2700_v31 = vrot.slane %v5379_v32, 2  ;;  %v2429_v15 = vrot.slane %v5379_v32, 1  ;;  %v6277_v32 = vld [vmem:[#allocation13_spill] sm:$0xff] }
 0x124   : > { %v3813_v4 = vpop.f32.mrf.mxu1  ;;  %4112 = vmatmul.mubr.msk.f32.gmra.mxu1 %vm355_vm2, %v6264_v11  ;;  %4164 = vmatprep.mubr.msk.f32.mxu0 %vm355_vm2, %v6238_v40 }
 0x125   : > { %v5536_v8 = vadd.f32 %v1237_v16, %v863_v25  ;;  %v878_v30 = vadd.f32 %v3813_v4, %v5283_v39  ;;  %v1247_v48 = vpop.f32.mrf.mxu0  ;;  %4114 = vmatprep.mubr.msk.f32.mxu1 %vm355_vm2, %v6265_v14  ;;  %v6272_v16 = vld [vmem:[#allocation34_spill] sm:$0xff]  ;;  %v6275_v14 = vld [vmem:[#allocation36_spill] sm:$0xff] }
 0x126   : > { %v872_v35 = vpop.f32.mrf.mxu1 }
 0x127   : > { %v5541_v1 = vadd.f32 %v3863_v33, %v878_v30  ;;  %v873_v24 = vadd.f32 %v872_v35, %v5293_v59  ;;  %v3866_v21 = vpop.f32.mrf.mxu0  ;;  %4165 = vmatmul.mubr.msk.f32.gmra.mxu0 %vm355_vm2, %v6239_v22  ;;  %v6274_v30 = vld [vmem:[#allocation21_spill] sm:$0xff] }
 0x128   : > { %v3816_v45 = vpop.f32.mrf.mxu1  ;;  %4115 = vmatmul.mubr.msk.f32.gmra.mxu1 %vm355_vm2, %v6266_v10  ;;  %4167 = vmatprep.mubr.msk.f32.mxu0 %vm355_vm2, %v4976_v38  ;;  %v6276_v35 = vld [vmem:[#allocation17_spill] sm:$0xff]  ;;  %v6278_v10 = vld [vmem:[#allocation26_spill] sm:$0xff] }
 0x129   : > { %v5550_v39 = vadd.f32 %v1247_v48, %v873_v24  ;;  %v888_v40 = vadd.f32 %v3816_v45, %v5299_v54  ;;  %v1257_v2 = vpop.f32.mrf.mxu0  ;;  %4117 = vmatprep.mubr.msk.f32.mxu1 %vm355_vm2, %v6267_v51 }
 0x12a   : > { %v882_v59 = vpop.f32.mrf.mxu1 }
 0x12b   : > { %v5555_v55 = vadd.f32 %v3866_v21, %v888_v40  ;;  %v883_v22 = vadd.f32 %v882_v59, %v5309_v7  ;;  %v3869_v23 = vpop.f32.mrf.mxu0  ;;  %4168 = vmatmul.mubr.msk.f32.gmra.mxu0 %vm355_vm2, %v4987_v58  ;;  %v2430_v59 = vsel %vm272_vm1, %v2428_v53, %v2429_v15 }
 0x12c   : > { %v3819_v5 = vpop.f32.mrf.mxu1  ;;  %4118 = vmatmul.mubr.msk.f32.gmra.mxu1 %vm355_vm2, %v6268_v60  ;;  %4170 = vmatprep.mubr.msk.f32.mxu0 %vm355_vm2, %v4993_v56  ;;  %v6270_v56 = vld [vmem:[#allocation32_spill] sm:$0xff] }
 0x12d   : > { %v5564_v38 = vadd.f32 %v1257_v2, %v883_v22  ;;  %v898_v54 = vadd.f32 %v3819_v5, %v5315_v6  ;;  %v1267_v50 = vpop.f32.mrf.mxu0  ;;  %4120 = vmatprep.mubr.msk.f32.mxu1 %vm355_vm2, %v6269_v44  ;;  %v2699_v6 = vrot.slane %v5360_v36, 2  ;;  %v6281_v44 = vld [vmem:[#allocation7_spill] sm:$0xff] }
 0x12e   : > { %v892_v7 = vpop.f32.mrf.mxu1 }
 0x12f   : > { %v5569_v0 = vadd.f32 %v3869_v23, %v898_v54  ;;  %v893_v58 = vadd.f32 %v892_v7, %v5325_v18  ;;  %v3872_v52 = vpop.f32.mrf.mxu0  ;;  %4171 = vmatmul.mubr.msk.f32.gmra.mxu0 %vm355_vm2, %v5004_v63  ;;  %v222_v63 = vld [vmem:[%s4379_s7 + $0x1a8] sm:$0x3]  ;;  %v2701_v40 = vsel %vm941_vm3, %v2699_v6, %v2700_v31  ;;  %v6279_v23 = vld [vmem:[#allocation15_spill] sm:$0xff]  ;;  %v6280_v54 = vld [vmem:[#allocation37_spill] sm:$0xff]  ;;  %s3434_s7 = sshll.u32 %s4332_s16, 12  ;;  %s6030_s16 = scalar_lea.sflag [#allocation3], %s161_s29 }
 0x130   : > { %v3822_v19 = vpop.f32.mrf.mxu1  ;;  %4121 = vmatmul.mubr.msk.f32.gmra.mxu1 %vm355_vm2, %v6270_v56  ;;  %4173 = vmatprep.mubr.msk.f32.mxu0 %vm355_vm2, %v5010_v13  ;;  %v6273_v13 = vld [vmem:[#allocation11_spill] sm:$0xff]  ;;  %v2702_v24 = vrot.slane %v222_v63, 2  ;;  %v2431_v2 = vrot.slane %v222_v63, 1  ;;  %s6021_s11 = scalar_lea.hbm %s6073_s3, %s3434_s7 }
 0x131   : > { %v5580_v47 = vadd.f32 %v1267_v50, %v893_v58  ;;  %v908_v41 = vadd.f32 %v3822_v19, %v6271_v29  ;;  %v1277_v18 = vpop.f32.mrf.mxu0  ;;  %4123 = vmatprep.mubr.msk.f32.mxu1 %vm355_vm2, %v6272_v16 }
 0x132   : > { %v902_v25 = vpop.f32.mrf.mxu1  ;;  %v2703_v7 = vsel %vm941_vm3, %v2700_v31, %v2702_v24  ;;  %v2432_v6 = vsel %vm272_vm1, %v2429_v15, %v2431_v2  ;;  %v6285_v15 = vld [vmem:[#allocation40_spill] sm:$0xff] }
 0x133   : > { %v5588_v33 = vadd.f32 %v3872_v52, %v908_v41  ;;  %v903_v4 = vadd.f32 %v902_v25, %v6273_v13  ;;  %v3875_v11 = vpop.f32.mrf.mxu0  ;;  %4174 = vmatmul.mubr.msk.f32.gmra.mxu0 %vm355_vm2, %v6274_v30  ;;  %v6282_v52 = vld [vmem:[#allocation22_spill] sm:$0xff]  ;;  %v6284_v25 = vld [vmem:[#allocation39_spill] sm:$0xff] }
 0x134   : > { %v3825_v48 = vpop.f32.mrf.mxu1  ;;  %4124 = vmatmul.mubr.msk.f32.gmra.mxu1 %vm355_vm2, %v6275_v14  ;;  %4176 = vmatprep.mubr.msk.f32.mxu0 %vm355_vm2, %v6276_v35 }
 0x135   : > { %v5597_v36 = vadd.f32 %v1277_v18, %v903_v4  ;;  %v918_v21 = vadd.f32 %v3825_v48, %v6277_v32  ;;  %v1287_v45 = vpop.f32.mrf.mxu0  ;;  %4126 = vmatprep.mubr.msk.f32.mxu1 %vm355_vm2, %v6278_v10  ;;  %v6283_v18 = vld [vmem:[#allocation38_spill] sm:$0xff] }
 0x136   : > { %v912_v51 = vpop.f32.mrf.mxu1 }
 0x137   : > { %v5604_v22 = vadd.f32 %v3875_v11, %v918_v21  ;;  %v913_v5 = vadd.f32 %v912_v51, %v6279_v23  ;;  %v3878_v60 = vpop.f32.mrf.mxu0  ;;  %4177 = vmatmul.mubr.msk.f32.gmra.mxu0 %vm355_vm2, %v6280_v54 }
 0x138   : > { %v3828_v50 = vpop.f32.mrf.mxu1  ;;  %4127 = vmatmul.mubr.msk.f32.gmra.mxu1 %vm355_vm2, %v6281_v44  ;;  %4179 = vmatprep.mubr.msk.f32.mxu0 %vm355_vm2, %v2701_v40 }
 0x139   : > { %v5613_v58 = vadd.f32 %v1287_v45, %v913_v5  ;;  %v928_v19 = vadd.f32 %v3828_v50, %v6282_v52  ;;  %v1297_v56 = vpop.f32.mrf.mxu0  ;;  %4129 = vmatprep.mubr.msk.f32.mxu1 %vm355_vm2, %v2430_v59 }
 0x13a   : > { %v922_v29 = vpop.f32.mrf.mxu1 }
 0x13b   : > { %v5618_v41 = vadd.f32 %v3878_v60, %v928_v19  ;;  %v923_v16 = vadd.f32 %v922_v29, %v6283_v18  ;;  %v3881_v63 = vpop.f32.mrf.mxu0  ;;  %4180 = vmatmul.mubr.msk.f32.gmra.mxu0 %vm355_vm2, %v2703_v7 }
 0x13c   : > { %v3831_v53 = vpop.f32.mrf.mxu1  ;;  %4130 = vmatmul.mubr.msk.f32.gmra.mxu1 %vm355_vm2, %v2432_v6 }
 0x13d   : > { %v5623_v31 = vadd.f32 %v1297_v56, %v923_v16  ;;  %v938_v13 = vadd.f32 %v3831_v53, %v6284_v25  ;;  %v1307_v4 = vpop.f32.mrf.mxu0 }
 0x13e   : > { %v932_v11 = vpop.f32.mrf.mxu1 }
 0x13f   : > { %v5626_v30 = vadd.f32 %v3881_v63, %v938_v13  ;;  %v933_v48 = vadd.f32 %v932_v11, %v6285_v15  ;;  %v3936_v14 = vpop.f32.mrf.mxu0 }
 0x140   : > { %v3886_v35 = vpop.f32.mrf.mxu1 }
 0x141   : > { %v5629_v24 = vadd.f32 %v1307_v4, %v933_v48  ;;  %v1585_v32 = vadd.f32 %v3886_v35, %v5415_v57  ;;  %v1697_v21 = vpop.f32.mrf.mxu0 }
 0x142   : > { %v1425_v45 = vpop.f32.mrf.mxu1 }
 0x143   : > { %v5632_v10 = vadd.f32 %v3936_v14, %v1585_v32  ;;  %v1584_v40 = vadd.f32 %v1425_v45, %v5424_v43  ;;  %v3939_v2 = vpop.f32.mrf.mxu0 }
 0x144   : > { %v3889_v51 = vpop.f32.mrf.mxu1 }
 0x145   : > { %v5635_v59 = vadd.f32 %v1697_v21, %v1584_v40  ;;  %v1587_v23 = vadd.f32 %v3889_v51, %v5429_v20  ;;  %v1707_v5 = vpop.f32.mrf.mxu0 }
 0x146   : > { %v1435_v60 = vpop.f32.mrf.mxu1 }
 0x147   : > { %v5638_v54 = vadd.f32 %v3939_v2, %v1587_v23  ;;  %v1586_v50 = vadd.f32 %v1435_v60, %v5438_v49  ;;  %v3942_v44 = vpop.f32.mrf.mxu0 }
 0x148   : > { %v3892_v57 = vpop.f32.mrf.mxu1 }
 0x149   : > { %v5641_v7 = vadd.f32 %v1707_v5, %v1586_v50  ;;  %v1589_v52 = vadd.f32 %v3892_v57, %v5443_v27  ;;  %v1717_v19 = vpop.f32.mrf.mxu0 }
 0x14a   : > { %v1445_v43 = vpop.f32.mrf.mxu1 }
 0x14b   : > { %v5644_v56 = vadd.f32 %v3942_v44, %v1589_v52  ;;  %v1588_v6 = vadd.f32 %v1445_v43, %v5452_v12  ;;  %v3945_v29 = vpop.f32.mrf.mxu0 }
 0x14c   : > { %v3895_v20 = vpop.f32.mrf.mxu1 }
 0x14d   : > { %v5647_v18 = vadd.f32 %v1717_v19, %v1588_v6  ;;  %v1591_v16 = vadd.f32 %v3895_v20, %v5457_v17  ;;  %v1727_v63 = vpop.f32.mrf.mxu0 }
 0x14e   : > { %v1455_v49 = vpop.f32.mrf.mxu1 }
 0x14f   : > { %v5650_v53 = vadd.f32 %v3945_v29, %v1591_v16  ;;  %v1590_v25 = vadd.f32 %v1455_v49, %v5466_v37  ;;  %v3948_v13 = vpop.f32.mrf.mxu0 }
 0x150   : > { %v3898_v27 = vpop.f32.mrf.mxu1 }
 0x151   : > { %v5653_v4 = vadd.f32 %v1727_v63, %v1590_v25  ;;  %v1593_v11 = vadd.f32 %v3898_v27, %v5471_v61  ;;  %v1737_v15 = vpop.f32.mrf.mxu0 }
 0x152   : > { %v1465_v12 = vpop.f32.mrf.mxu1 }
 0x153   : > { %v5656_v48 = vadd.f32 %v3948_v13, %v1593_v11  ;;  %v1592_v14 = vadd.f32 %v1465_v12, %v5480_v28  ;;  %v3951_v35 = vpop.f32.mrf.mxu0 }
 0x154   : > { %v3901_v17 = vpop.f32.mrf.mxu1 }
 0x155   : > { %v5659_v32 = vadd.f32 %v1737_v15, %v1592_v14  ;;  %v1595_v21 = vadd.f32 %v3901_v17, %v5485_v46  ;;  %v1747_v45 = vpop.f32.mrf.mxu0 }
 0x156   : > { %v1475_v37 = vpop.f32.mrf.mxu1 }
 0x157   : > { %v5662_v40 = vadd.f32 %v3951_v35, %v1595_v21  ;;  %v1594_v2 = vadd.f32 %v1475_v37, %v5494_v62  ;;  %v3954_v51 = vpop.f32.mrf.mxu0 }
 0x158   : > { %v3904_v61 = vpop.f32.mrf.mxu1 }
 0x159   : > { %v5665_v23 = vadd.f32 %v1747_v45, %v1594_v2  ;;  %v1597_v5 = vadd.f32 %v3904_v61, %v5499_v34  ;;  %v1757_v60 = vpop.f32.mrf.mxu0 }
 0x15a   : > { %v1485_v28 = vpop.f32.mrf.mxu1 }
 0x15b   : > { %v5668_v50 = vadd.f32 %v3954_v51, %v1597_v5  ;;  %v1596_v44 = vadd.f32 %v1485_v28, %v5508_v26  ;;  %v3957_v57 = vpop.f32.mrf.mxu0 }
 0x15c   : > { %v3907_v46 = vpop.f32.mrf.mxu1 }
 0x15d   : > { %v5671_v52 = vadd.f32 %v1757_v60, %v1596_v44  ;;  %v1599_v19 = vadd.f32 %v3907_v46, %v5513_v9  ;;  %v1767_v43 = vpop.f32.mrf.mxu0 }
 0x15e   : > { %v1495_v62 = vpop.f32.mrf.mxu1 }
 0x15f   : > { %v5674_v6 = vadd.f32 %v3957_v57, %v1599_v19  ;;  %v1598_v29 = vadd.f32 %v1495_v62, %v5522_v42  ;;  %v3960_v20 = vpop.f32.mrf.mxu0 }
 0x160   : > { %v3910_v34 = vpop.f32.mrf.mxu1 }
 0x161   : > { %v5677_v16 = vadd.f32 %v1767_v43, %v1598_v29  ;;  %v1601_v63 = vadd.f32 %v3910_v34, %v5527_v3  ;;  %v1777_v49 = vpop.f32.mrf.mxu0 }
 0x162   : > { %v1505_v26 = vpop.f32.mrf.mxu1 }
 0x163   : > { %v5680_v25 = vadd.f32 %v3960_v20, %v1601_v63  ;;  %v1600_v13 = vadd.f32 %v1505_v26, %v5536_v8  ;;  %v3963_v27 = vpop.f32.mrf.mxu0 }
 0x164   : > { %v3913_v9 = vpop.f32.mrf.mxu1 }
 0x165   : > { %v5683_v11 = vadd.f32 %v1777_v49, %v1600_v13  ;;  %v1603_v15 = vadd.f32 %v3913_v9, %v5541_v1  ;;  %v1787_v12 = vpop.f32.mrf.mxu0 }
 0x166   : > { %v1515_v42 = vpop.f32.mrf.mxu1 }
 0x167   : > { %v5686_v14 = vadd.f32 %v3963_v27, %v1603_v15  ;;  %v1602_v35 = vadd.f32 %v1515_v42, %v5550_v39  ;;  %v3966_v17 = vpop.f32.mrf.mxu0 }
 0x168   : > { %v3916_v3 = vpop.f32.mrf.mxu1 }
 0x169   : > { %6286 = vst [vmem:[#allocation41_spill] sm:$0xff] %v5686_v14  ;;  %v5689_v21 = vadd.f32 %v1787_v12, %v1602_v35  ;;  %v1605_v45 = vadd.f32 %v3916_v3, %v5555_v55  ;;  %v1797_v37 = vpop.f32.mrf.mxu0 }
 0x16a   : > { %v1525_v8 = vpop.f32.mrf.mxu1 }
 0x16b   : > { %6287 = vst [vmem:[#allocation42_spill] sm:$0xff] %v5689_v21  ;;  %v5692_v2 = vadd.f32 %v3966_v17, %v1605_v45  ;;  %v1604_v51 = vadd.f32 %v1525_v8, %v5564_v38  ;;  %v3969_v61 = vpop.f32.mrf.mxu0 }
 0x16c   : > { %v3919_v1 = vpop.f32.mrf.mxu1 }
 0x16d   : > { %6288 = vst [vmem:[#allocation43_spill] sm:$0xff] %v5692_v2  ;;  %v5695_v5 = vadd.f32 %v1797_v37, %v1604_v51  ;;  %v1607_v60 = vadd.f32 %v3919_v1, %v5569_v0  ;;  %v1807_v28 = vpop.f32.mrf.mxu0 }
 0x16e   : > { %v1535_v39 = vpop.f32.mrf.mxu1 }
 0x16f   : > { %6289 = vst [vmem:[#allocation44_spill] sm:$0xff] %v5695_v5  ;;  %v5698_v44 = vadd.f32 %v3969_v61, %v1607_v60  ;;  %v1606_v57 = vadd.f32 %v1535_v39, %v5580_v47  ;;  %v3972_v46 = vpop.f32.mrf.mxu0 }
 0x170   : > { %v3922_v55 = vpop.f32.mrf.mxu1 }
 0x171   : > { %6290 = vst [vmem:[#allocation45_spill] sm:$0xff] %v5698_v44  ;;  %v5701_v19 = vadd.f32 %v1807_v28, %v1606_v57  ;;  %v1609_v43 = vadd.f32 %v3922_v55, %v5588_v33  ;;  %v1817_v62 = vpop.f32.mrf.mxu0 }
 0x172   : > { %v1545_v38 = vpop.f32.mrf.mxu1 }
 0x173   : > { %6291 = vst [vmem:[#allocation46_spill] sm:$0xff] %v5701_v19  ;;  %v5704_v29 = vadd.f32 %v3972_v46, %v1609_v43  ;;  %v1608_v20 = vadd.f32 %v1545_v38, %v5597_v36  ;;  %v3975_v34 = vpop.f32.mrf.mxu0 }
 0x174   : > { %v3925_v0 = vpop.f32.mrf.mxu1 }
 0x175   : > { %6292 = vst [vmem:[#allocation47_spill] sm:$0xff] %v5704_v29  ;;  %v5707_v63 = vadd.f32 %v1817_v62, %v1608_v20  ;;  %v1611_v49 = vadd.f32 %v3925_v0, %v5604_v22  ;;  %v1827_v26 = vpop.f32.mrf.mxu0 }
 0x176   : > { %v1555_v47 = vpop.f32.mrf.mxu1 }
 0x177   : > { %6293 = vst [vmem:[#allocation19_spill] sm:$0xff] %v5707_v63  ;;  %v5710_v13 = vadd.f32 %v3975_v34, %v1611_v49  ;;  %v1610_v27 = vadd.f32 %v1555_v47, %v5613_v58  ;;  %v3978_v9 = vpop.f32.mrf.mxu0 }
 0x178   : > { %v3928_v33 = vpop.f32.mrf.mxu1 }
 0x179   : > { %6294 = vst [vmem:[#allocation24_spill] sm:$0xff] %v5710_v13  ;;  %v5713_v15 = vadd.f32 %v1827_v26, %v1610_v27  ;;  %v1613_v12 = vadd.f32 %v3928_v33, %v5618_v41  ;;  %v1837_v42 = vpop.f32.mrf.mxu0 }
 0x17a   : > { %v1565_v36 = vpop.f32.mrf.mxu1 }
 0x17b   : > { %6295 = vst [vmem:[#allocation27_spill] sm:$0xff] %v5713_v15  ;;  %v5716_v35 = vadd.f32 %v3978_v9, %v1613_v12  ;;  %v1612_v17 = vadd.f32 %v1565_v36, %v5623_v31  ;;  %v3981_v3 = vpop.f32.mrf.mxu0 }
 0x17c   : > { %v3931_v22 = vpop.f32.mrf.mxu1 }
 0x17d   : > { %6296 = vst [vmem:[#allocation29_spill] sm:$0xff] %v5716_v35  ;;  %v5719_v45 = vadd.f32 %v1837_v42, %v1612_v17  ;;  %v1615_v37 = vadd.f32 %v3931_v22, %v5626_v30  ;;  %v1847_v8 = vpop.f32.mrf.mxu0 }
 0x17e   : > { %v1575_v58 = vpop.f32.mrf.mxu1 }
 0x17f   : > { %6297 = vst [vmem:[#allocation31_spill] sm:$0xff] %v5719_v45  ;;  %v5722_v51 = vadd.f32 %v3981_v3, %v1615_v37  ;;  %v1614_v61 = vadd.f32 %v1575_v58, %v5629_v24  ;;  %v5725_v1 = vpop.f32.mrf.mxu0 }
 0x180   : > { %v3986_v41 = vpop.f32.mrf.mxu1 }
 0x181   : > { %6298 = vst [vmem:[#allocation33_spill] sm:$0xff] %v5722_v51  ;;  %v5727_v60 = vadd.f32 %v1847_v8, %v1614_v61  ;;  %v5729_v28 = vpop.f32.mrf.mxu0 }
 0x182   : > { %v1968_v31 = vpop.f32.mrf.mxu1 }
 0x183   : > { %6299 = vst [vmem:[#allocation35_spill] sm:$0xff] %v5727_v60  ;;  %v5731_v39 = vpop.f32.mrf.mxu0 }
 0x184   : > { %v5733_v57 = vpop.f32.mrf.mxu1 }
 0x185   : > { %v5735_v46 = vpop.f32.mrf.mxu0 }
 0x186   : > { %v5737_v30 = vpop.f32.mrf.mxu1 }
 0x187   : > { %v5739_v55 = vpop.f32.mrf.mxu0 }
 0x188   : > { %v5741_v43 = vpop.f32.mrf.mxu1 }
 0x189   : > { %v5743_v24 = vpop.f32.mrf.mxu0 }
 0x18a   : > { %v5745_v62 = vpop.f32.mrf.mxu1 }
 0x18b   : > { %v5747_v38 = vpop.f32.mrf.mxu0 }
 0x18c   : > { %v5749_v20 = vpop.f32.mrf.mxu1 }
 0x18d   : > { %v5751_v34 = vpop.f32.mrf.mxu0 }
 0x18e   : > { %v5753_v0 = vpop.f32.mrf.mxu1 }
 0x18f   : > { %v5755_v49 = vpop.f32.mrf.mxu0 }
 0x190   : > { %v5757_v26 = vpop.f32.mrf.mxu1 }
 0x191   : > { %v5759_v47 = vpop.f32.mrf.mxu0 }
 0x192   : > { %v5761_v27 = vpop.f32.mrf.mxu1 }
 0x193   : > { %v5763_v9 = vpop.f32.mrf.mxu0 }
 0x194   : > { %v5765_v33 = vpop.f32.mrf.mxu1 }
 0x195   : > { %v5767_v12 = vpop.f32.mrf.mxu0 }
 0x196   : > { %v5769_v42 = vpop.f32.mrf.mxu1 }
 0x197   : > { %v5771_v36 = vpop.f32.mrf.mxu0 }
 0x198   : > { %v5773_v17 = vpop.f32.mrf.mxu1 }
 0x199   : > { %v5775_v3 = vpop.f32.mrf.mxu0 }
 0x19a   : > { %v5777_v22 = vpop.f32.mrf.mxu1 }
 0x19b   : > { %v5779_v37 = vpop.f32.mrf.mxu0 }
 0x19c   : > { %v5781_v8 = vpop.f32.mrf.mxu1 }
 0x19d   : > { %v5783_v58 = vpop.f32.mrf.mxu0 }
 0x19e   : > { %v5785_v61 = vpop.f32.mrf.mxu1 }
 0x19f   : > { %v5787_v60 = vpop.f32.mrf.mxu0 }
 0x1a0   : > { %v5789_v51 = vpop.f32.mrf.mxu1 }
 0x1a1   : > { %v5791_v45 = vpop.f32.mrf.mxu0 }
 0x1a2   : > { %6300 = vst [vmem:[#allocation5_spill] sm:$0xff] %v5791_v45  ;;  %v5793_v35 = vpop.f32.mrf.mxu1 }
 0x1a3   : > { %v5795_v15 = vpop.f32.mrf.mxu0 }
 0x1a4   : > { %6301 = vst [vmem:[#allocation6_spill] sm:$0xff] %v5795_v15  ;;  %v5797_v13 = vpop.f32.mrf.mxu1 }
 0x1a5   : > { %6302 = vst [vmem:[#allocation8_spill] sm:$0xff] %v5797_v13  ;;  %v5799_v63 = vpop.f32.mrf.mxu0 }
 0x1a6   : > { %6303 = vst [vmem:[#allocation10_spill] sm:$0xff] %v5799_v63  ;;  %v5801_v29 = vpop.f32.mrf.mxu1 }
 0x1a7   : > { %6304 = vst [vmem:[#allocation12_spill] sm:$0xff] %v5801_v29  ;;  %v5803_v19 = vpop.f32.mrf.mxu0 }
 0x1a8   : > { %6305 = vst [vmem:[#allocation14_spill] sm:$0xff] %v5803_v19  ;;  %v5805_v44 = vpop.f32.mrf.mxu1 }
 0x1a9   : > { %v5807_v5 = vpop.f32.mrf.mxu0 }
 0x1aa   : > { %6306 = vst [vmem:[#allocation16_spill] sm:$0xff] %v5807_v5  ;;  %v5809_v2 = vpop.f32.mrf.mxu1 }
 0x1ab   : > { %6307 = vst [vmem:[#allocation18_spill] sm:$0xff] %v5809_v2  ;;  %v5811_v21 = vpop.f32.mrf.mxu0 }
 0x1ac   : > { %6308 = vst [vmem:[#allocation20_spill] sm:$0xff] %v5811_v21  ;;  %v5813_v45 = vpop.f32.mrf.mxu1 }
 0x1ad   : > { %6309 = vst [vmem:[#allocation23_spill] sm:$0xff] %v5813_v45  ;;  %v5815_v14 = vpop.f32.mrf.mxu0 }
 0x1ae   : > { %6310 = vst [vmem:[#allocation25_spill] sm:$0xff] %v5815_v14  ;;  %v5817_v15 = vpop.f32.mrf.mxu1 }
 0x1af   : > { %6311 = vst [vmem:[#allocation28_spill] sm:$0xff] %v5817_v15  ;;  %v5819_v13 = vpop.f32.mrf.mxu0 }
 0x1b0   : > { %6312 = vst [vmem:[#allocation30_spill] sm:$0xff] %v5819_v13  ;;  %v5821_v63 = vpop.f32.mrf.mxu1 }
 0x1b1   : > { %6313 = vst [vmem:[#allocation32_spill] sm:$0xff] %v5821_v63  ;;  %v5823_v29 = vpop.f32.mrf.mxu0 }
 0x1b2   : > { %6314 = vst [vmem:[#allocation9_spill] sm:$0xff] %v5823_v29  ;;  %v5825_v19 = vpop.f32.mrf.mxu1  ;;  %v2128_v29 = vadd.f32 %v3986_v41, %v5632_v10  ;;  %v2129_v41 = vadd.f32 %v5737_v30, %v5641_v7  ;;  %v2131_v7 = vadd.f32 %v5745_v62, %v5647_v18 }
 0x1b3   : > { %6315 = vst [vmem:[#allocation34_spill] sm:$0xff] %v5825_v19  ;;  %v5827_v5 = vpop.f32.mrf.mxu0 }
 0x1b4   : > { %6316 = vst [vmem:[#allocation11_spill] sm:$0xff] %v5827_v5  ;;  %v5829_v2 = vpop.f32.mrf.mxu1 }
 0x1b5   : > { %6317 = vst [vmem:[#allocation21_spill] sm:$0xff] %v5829_v2  ;;  %v5831_v21 = vpop.f32.mrf.mxu0  ;;  %v2127_v2 = vadd.f32 %v1968_v31, %v5635_v59  ;;  %v2132_v31 = vadd.f32 %v5741_v43, %v5644_v56 }
 0x1b6   : > { %6318 = vst [vmem:[#allocation36_spill] sm:$0xff] %v5831_v21  ;;  %v5833_v45 = vpop.f32.mrf.mxu1 }
 0x1b7   : > { %6319 = vst [vmem:[#allocation17_spill] sm:$0xff] %v5833_v45  ;;  %v5835_v14 = vpop.f32.mrf.mxu0  ;;  %v2395_v10 = vadd.f32 %v5729_v28, %v2127_v2 }
 0x1b8   : > { %6320 = vst [vmem:[#allocation13_spill] sm:$0xff] %v5835_v14  ;;  %v5837_v15 = vpop.f32.mrf.mxu1  ;;  %v2396_v14 = vadd.f32 %v5725_v1, %v2128_v29  ;;  %v5867_v29 = vld [vmem:[%s6072_s2] ss:$0 sm:$0xff] }
 0x1b9   : > { %6321 = vst [vmem:[#allocation26_spill] sm:$0xff] %v5837_v15  ;;  %v5839_v13 = vpop.f32.mrf.mxu0 }
 0x1ba   : > { %6322 = vst [vmem:[#allocation15_spill] sm:$0xff] %v5839_v13  ;;  %v5841_v63 = vpop.f32.mrf.mxu1  ;;  %v2130_v13 = vadd.f32 %v5733_v57, %v5638_v54 }
 0x1bb   : > { %6323 = vst [vmem:[#allocation37_spill] sm:$0xff] %v5841_v63  ;;  %v5844_v19 = vpop.f32.mrf.mxu0 }
 0x1bc   : > { %6324 = vst [vmem:[#allocation7_spill] sm:$0xff] %v5844_v19  ;;  %v5846_v5 = vpop.f32.mrf.mxu1  ;;  %v2398_v1 = vadd.f32 %v5731_v39, %v2130_v13  ;;  %v2134_v13 = vadd.f32 %v5749_v20, %v5650_v53 }
 0x1bd   : > { %6325 = vst [vmem:[#allocation22_spill] sm:$0xff] %v5846_v5  ;;  %v5849_v21 = vpop.f32.mrf.mxu0 }
 0x1be   : > { %6326 = vst [vmem:[#allocation38_spill] sm:$0xff] %v5849_v21  ;;  %v5851_v45 = vpop.f32.mrf.mxu1 }
 0x1bf   : > { %6327 = vst [vmem:[#allocation39_spill] sm:$0xff] %v5851_v45  ;;  %v4136_v15 = vpop.f32.mrf.mxu0  ;;  %v2400_v45 = vadd.f32 %v5739_v55, %v2132_v31  ;;  %v2133_v55 = vadd.f32 %v5753_v0, %v5653_v4  ;;  %v2135_v0 = vadd.f32 %v5761_v27, %v5659_v32 }
 0x1c0   : > { %v4086_v63 = vpop.f32.mrf.mxu1 }
 0x1c1   : > { %v2668_v19 = vadd.f32 %v4086_v63, %v2396_v14  ;;  %v2779_v59 = vpop.f32.mrf.mxu0  ;;  %v2397_v63 = vadd.f32 %v5735_v46, %v2129_v41  ;;  %v2399_v46 = vadd.f32 %v5743_v24, %v2131_v7  ;;  %v2138_v7 = vadd.f32 %v5765_v33, %v5662_v40 }
 0x1c2   : > { %v2508_v54 = vpop.f32.mrf.mxu1  ;;  %v2140_v33 = vadd.f32 %v5773_v17, %v5668_v50 }
 0x1c3   : > { %v2939_v57 = vadd.f32 %v4136_v15, %v2668_v19  ;;  %v2667_v2 = vadd.f32 %v2508_v54, %v2395_v10  ;;  %v4139_v28 = vpop.f32.mrf.mxu0 }
 0x1c4   : > { %v4089_v14 = vpop.f32.mrf.mxu1 }
 0x1c5   : > { %v2978_v30 = vadd.f32 %v5867_v29, %v2939_v57  ;;  %v2938_v56 = vadd.f32 %v2779_v59, %v2667_v2  ;;  %v2670_v43 = vadd.f32 %v4089_v14, %v2398_v1  ;;  %v2789_v21 = vpop.f32.mrf.mxu0  ;;  %v2136_v59 = vadd.f32 %v5757_v26, %v5656_v48 }
 0x1c6   : > { %v2518_v5 = vpop.f32.mrf.mxu1 }
 0x1c7   : > { %3010 = vst [vmem:[%s5877_s6 + $0x8] sm:$0xff] %v2978_v30  ;;  %v2977_v18 = vadd.f32 %v5867_v29, %v2938_v56  ;;  %v2941_v19 = vadd.f32 %v4139_v28, %v2670_v43  ;;  %v2669_v15 = vadd.f32 %v2518_v5, %v2397_v63  ;;  %v4142_v39 = vpop.f32.mrf.mxu0  ;;  %v2402_v5 = vadd.f32 %v5747_v38, %v2134_v13 }
 0x1c8   : > { %v4092_v62 = vpop.f32.mrf.mxu1  ;;  %v2404_v2 = vadd.f32 %v5755_v49, %v2136_v59  ;;  %v2403_v63 = vadd.f32 %v5759_v47, %v2135_v0  ;;  %v2137_v56 = vadd.f32 %v5769_v42, %v5665_v23  ;;  %v2139_v42 = vadd.f32 %v5777_v22, %v5671_v52 }
 0x1c9   : > { %3009 = vst [vmem:[%s5877_s6] sm:$0xff] %v2977_v18  ;;  %v2980_v53 = vadd.f32 %v5867_v29, %v2941_v19  ;;  %v2940_v20 = vadd.f32 %v2789_v21, %v2669_v15  ;;  %v2672_v10 = vadd.f32 %v4092_v62, %v2400_v45  ;;  %v2799_v41 = vpop.f32.mrf.mxu0  ;;  %v2401_v21 = vadd.f32 %v5751_v34, %v2133_v55 }
 0x1ca   : > { %v2528_v31 = vpop.f32.mrf.mxu1  ;;  %v2406_v19 = vadd.f32 %v5763_v9, %v2138_v7  ;;  %v2405_v62 = vadd.f32 %v5767_v12, %v2137_v56  ;;  %v2407_v59 = vadd.f32 %v5775_v3, %v2139_v42 }
 0x1cb   : > { %3012 = vst [vmem:[%s5877_s6 + $0x18] sm:$0xff] %v2980_v53  ;;  %v2979_v24 = vadd.f32 %v5867_v29, %v2940_v20  ;;  %v2943_v54 = vadd.f32 %v4142_v39, %v2672_v10  ;;  %v2671_v1 = vadd.f32 %v2528_v31, %v2399_v46  ;;  %v4145_v4 = vpop.f32.mrf.mxu0  ;;  %v2408_v53 = vadd.f32 %v5771_v36, %v2140_v33 }
 0x1cc   : > { %v4095_v57 = vpop.f32.mrf.mxu1  ;;  %v2142_v10 = vadd.f32 %v5781_v8, %v5674_v6  ;;  %v2144_v8 = vadd.f32 %v5789_v51, %v5680_v25 }
 0x1cd   : > { %3011 = vst [vmem:[%s5877_s6 + $0x10] sm:$0xff] %v2979_v24  ;;  %v2982_v48 = vadd.f32 %v5867_v29, %v2943_v54  ;;  %v2942_v45 = vadd.f32 %v2799_v41, %v2671_v1  ;;  %v2674_v26 = vadd.f32 %v4095_v57, %v2402_v5  ;;  %v2809_v38 = vpop.f32.mrf.mxu0  ;;  %v2141_v5 = vadd.f32 %v5785_v61, %v5677_v16 }
 0x1ce   : > { %v2538_v28 = vpop.f32.mrf.mxu1  ;;  %v2143_v61 = vadd.f32 %v5793_v35, %v5683_v11 }
 0x1cf   : > { %3014 = vst [vmem:[%s5877_s6 + $0x28] sm:$0xff] %v2982_v48  ;;  %v2981_v32 = vadd.f32 %v5867_v29, %v2942_v45  ;;  %v2945_v27 = vadd.f32 %v4145_v4, %v2674_v26  ;;  %v2673_v14 = vadd.f32 %v2538_v28, %v2401_v21  ;;  %v4148_v34 = vpop.f32.mrf.mxu0  ;;  %v2410_v4 = vadd.f32 %v5779_v37, %v2142_v10  ;;  %v6329_v28 = vld [vmem:[#allocation8_spill] sm:$0xff] }
 0x1d0   : > { %v4098_v30 = vpop.f32.mrf.mxu1  ;;  %v2409_v48 = vadd.f32 %v5783_v58, %v2141_v5  ;;  %v2412_v26 = vadd.f32 %v5787_v60, %v2144_v8 }
 0x1d1   : > { %3013 = vst [vmem:[%s5877_s6 + $0x20] sm:$0xff] %v2981_v32  ;;  %v2984_v49 = vadd.f32 %v5867_v29, %v2945_v27  ;;  %v2944_v43 = vadd.f32 %v2809_v38, %v2673_v14  ;;  %v2676_v13 = vadd.f32 %v4098_v30, %v2404_v2  ;;  %v2819_v40 = vpop.f32.mrf.mxu0  ;;  %v6328_v2 = vld [vmem:[#allocation41_spill] sm:$0xff]  ;;  %v6332_v30 = vld [vmem:[#allocation12_spill] sm:$0xff] }
 0x1d2   : > { %v2548_v18 = vpop.f32.mrf.mxu1  ;;  %v2146_v7 = vadd.f32 %v6329_v28, %v6328_v2  ;;  %v6330_v27 = vld [vmem:[#allocation5_spill] sm:$0xff] }
 0x1d3   : > { %3016 = vst [vmem:[%s5877_s6 + $0x38] sm:$0xff] %v2984_v49  ;;  %v2983_v47 = vadd.f32 %v5867_v29, %v2944_v43  ;;  %v2947_v15 = vadd.f32 %v4148_v34, %v2676_v13  ;;  %v2675_v39 = vadd.f32 %v2548_v18, %v2403_v63  ;;  %v4151_v23 = vpop.f32.mrf.mxu0  ;;  %v2411_v14 = vadd.f32 %v6330_v27, %v2143_v61  ;;  %v6331_v63 = vld [vmem:[#allocation42_spill] sm:$0xff]  ;;  %v6349_v27 = vld [vmem:[#allocation25_spill] sm:$0xff] }
 0x1d4   : > { %v4101_v46 = vpop.f32.mrf.mxu1  ;;  %v2145_v56 = vadd.f32 %v6332_v30, %v6331_v63 }
 0x1d5   : > { %3015 = vst [vmem:[%s5877_s6 + $0x30] sm:$0xff] %v2983_v47  ;;  %v2986_v50 = vadd.f32 %v5867_v29, %v2947_v15  ;;  %v2946_v17 = vadd.f32 %v2819_v40, %v2675_v39  ;;  %v2678_v55 = vadd.f32 %v4101_v46, %v2406_v19  ;;  %v2829_v9 = vpop.f32.mrf.mxu0  ;;  %v6333_v40 = vld [vmem:[#allocation43_spill] sm:$0xff]  ;;  %v6334_v19 = vld [vmem:[#allocation6_spill] sm:$0xff]  ;;  %v6335_v46 = vld [vmem:[#allocation44_spill] sm:$0xff] }
 0x1d6   : > { %v2558_v20 = vpop.f32.mrf.mxu1  ;;  %v2148_v33 = vadd.f32 %v5805_v44, %v6333_v40  ;;  %v2414_v47 = vadd.f32 %v6334_v19, %v2146_v7  ;;  %v6352_v40 = vld [vmem:[#allocation21_spill] sm:$0xff] }
 0x1d7   : > { %3018 = vst [vmem:[%s5877_s6 + $0x48] sm:$0xff] %v2986_v50  ;;  %v2985_v52 = vadd.f32 %v5867_v29, %v2946_v17  ;;  %v2949_v22 = vadd.f32 %v4151_v23, %v2678_v55  ;;  %v2677_v41 = vadd.f32 %v2558_v20, %v2405_v62  ;;  %v4154_v12 = vpop.f32.mrf.mxu0  ;;  %v6336_v62 = vld [vmem:[#allocation18_spill] sm:$0xff] }
 0x1d8   : > { %v4104_v31 = vpop.f32.mrf.mxu1  ;;  %v2147_v50 = vadd.f32 %v6336_v62, %v6335_v46  ;;  %v6337_v55 = vld [vmem:[#allocation10_spill] sm:$0xff]  ;;  %v6354_v46 = vld [vmem:[#allocation27_spill] sm:$0xff]  ;;  %v6355_v62 = vld [vmem:[#allocation17_spill] sm:$0xff] }
 0x1d9   : > { %3017 = vst [vmem:[%s5877_s6 + $0x40] sm:$0xff] %v2985_v52  ;;  %v2988_v36 = vadd.f32 %v5867_v29, %v2949_v22  ;;  %v2948_v24 = vadd.f32 %v2829_v9, %v2677_v41  ;;  %v2680_v54 = vadd.f32 %v4104_v31, %v2408_v53  ;;  %v2839_v6 = vpop.f32.mrf.mxu0  ;;  %v2413_v9 = vadd.f32 %v6337_v55, %v2145_v56  ;;  %v6338_v52 = vld [vmem:[#allocation14_spill] sm:$0xff] }
 0x1da   : > { %v2568_v1 = vpop.f32.mrf.mxu1  ;;  %v2416_v22 = vadd.f32 %v6338_v52, %v2148_v33 }
 0x1db   : > { %3020 = vst [vmem:[%s5877_s6 + $0x58] sm:$0xff] %v2988_v36  ;;  %v2987_v3 = vadd.f32 %v5867_v29, %v2948_v24  ;;  %v2951_v0 = vadd.f32 %v4154_v12, %v2680_v54  ;;  %v2679_v57 = vadd.f32 %v2568_v1, %v2407_v59  ;;  %v4157_v16 = vpop.f32.mrf.mxu0  ;;  %v6339_v12 = vld [vmem:[#allocation45_spill] sm:$0xff]  ;;  %v6340_v59 = vld [vmem:[#allocation23_spill] sm:$0xff] }
 0x1dc   : > { %v4107_v21 = vpop.f32.mrf.mxu1  ;;  %v2150_v31 = vadd.f32 %v6340_v59, %v6339_v12 }
 0x1dd   : > { %3019 = vst [vmem:[%s5877_s6 + $0x50] sm:$0xff] %v2987_v3  ;;  %v2990_v25 = vadd.f32 %v5867_v29, %v2951_v0  ;;  %v2950_v51 = vadd.f32 %v2839_v6, %v2679_v57  ;;  %v2682_v45 = vadd.f32 %v4107_v21, %v2410_v4  ;;  %v2849_v37 = vpop.f32.mrf.mxu0  ;;  %v6341_v6 = vld [vmem:[#allocation16_spill] sm:$0xff]  ;;  %v6342_v4 = vld [vmem:[#allocation46_spill] sm:$0xff] }
 0x1de   : > { %v2578_v38 = vpop.f32.mrf.mxu1  ;;  %v2415_v8 = vadd.f32 %v6341_v6, %v2147_v50  ;;  %v6343_v3 = vld [vmem:[#allocation28_spill] sm:$0xff]  ;;  %v2153_v50 = vadd.f32 %v6355_v62, %v6354_v46 }
 0x1df   : > { %3022 = vst [vmem:[%s5877_s6 + $0x68] sm:$0xff] %v2990_v25  ;;  %v2989_v11 = vadd.f32 %v5867_v29, %v2950_v51  ;;  %v2953_v35 = vadd.f32 %v4157_v16, %v2682_v45  ;;  %v2681_v32 = vadd.f32 %v2578_v38, %v2409_v48  ;;  %v4160_v58 = vpop.f32.mrf.mxu0  ;;  %v2149_v0 = vadd.f32 %v6343_v3, %v6342_v4  ;;  %v6344_v48 = vld [vmem:[#allocation47_spill] sm:$0xff]  ;;  %v6345_v25 = vld [vmem:[#allocation32_spill] sm:$0xff] }
 0x1e0   : > { %v4110_v34 = vpop.f32.mrf.mxu1  ;;  %v2152_v51 = vadd.f32 %v6345_v25, %v6344_v48  ;;  %v6363_v48 = vld [vmem:[#allocation33_spill] sm:$0xff]  ;;  %v6364_v25 = vld [vmem:[#allocation22_spill] sm:$0xff] }
 0x1e1   : > { %3021 = vst [vmem:[%s5877_s6 + $0x60] sm:$0xff] %v2989_v11  ;;  %v2992_v60 = vadd.f32 %v5867_v29, %v2953_v35  ;;  %v2952_v49 = vadd.f32 %v2849_v37, %v2681_v32  ;;  %v2684_v43 = vadd.f32 %v4110_v34, %v2412_v26  ;;  %v2859_v13 = vpop.f32.mrf.mxu0  ;;  %v6346_v37 = vld [vmem:[#allocation20_spill] sm:$0xff]  ;;  %v6347_v11 = vld [vmem:[#allocation19_spill] sm:$0xff]  ;;  %v6348_v35 = vld [vmem:[#allocation34_spill] sm:$0xff] }
 0x1e2   : > { %v2588_v18 = vpop.f32.mrf.mxu1  ;;  %v2418_v26 = vadd.f32 %v6346_v37, %v2150_v31  ;;  %v2151_v32 = vadd.f32 %v6348_v35, %v6347_v11  ;;  %v6366_v11 = vld [vmem:[#allocation35_spill] sm:$0xff] }
 0x1e3   : > { %3024 = vst [vmem:[%s5877_s6 + $0x78] sm:$0xff] %v2992_v60  ;;  %v2991_v15 = vadd.f32 %v5867_v29, %v2952_v49  ;;  %v2955_v39 = vadd.f32 %v4160_v58, %v2684_v43  ;;  %v2683_v23 = vadd.f32 %v2588_v18, %v2411_v14  ;;  %v4163_v42 = vpop.f32.mrf.mxu0  ;;  %v2417_v14 = vadd.f32 %v6349_v27, %v2149_v0  ;;  %v6350_v60 = vld [vmem:[#allocation30_spill] sm:$0xff]  ;;  %v6367_v35 = vld [vmem:[#allocation39_spill] sm:$0xff] }
 0x1e4   : > { %v4113_v17 = vpop.f32.mrf.mxu1  ;;  %v2420_v49 = vadd.f32 %v6350_v60, %v2152_v51  ;;  %v2158_v51 = vadd.f32 %v6364_v25, %v6363_v48 }
 0x1e5   : > { %3023 = vst [vmem:[%s5877_s6 + $0x70] sm:$0xff] %v2991_v15  ;;  %v2994_v44 = vadd.f32 %v5867_v29, %v2955_v39  ;;  %v2954_v53 = vadd.f32 %v2859_v13, %v2683_v23  ;;  %v2686_v20 = vadd.f32 %v4113_v17, %v2414_v47  ;;  %v2869_v10 = vpop.f32.mrf.mxu0  ;;  %v6351_v13 = vld [vmem:[#allocation24_spill] sm:$0xff]  ;;  %v6353_v39 = vld [vmem:[#allocation9_spill] sm:$0xff] }
 0x1e6   : > { %v2598_v41 = vpop.f32.mrf.mxu1  ;;  %v2154_v33 = vadd.f32 %v6352_v40, %v6351_v13  ;;  %v2419_v23 = vadd.f32 %v6353_v39, %v2151_v32  ;;  %v2157_v32 = vadd.f32 %v6367_v35, %v6366_v11 }
 0x1e7   : > { %3026 = vst [vmem:[%s5877_s6 + $0x88] sm:$0xff] %v2994_v44  ;;  %v2993_v5 = vadd.f32 %v5867_v29, %v2954_v53  ;;  %v2957_v36 = vadd.f32 %v4163_v42, %v2686_v20  ;;  %v2685_v24 = vadd.f32 %v2598_v41, %v2413_v9  ;;  %v4166_v54 = vpop.f32.mrf.mxu0  ;;  %v6356_v53 = vld [vmem:[#allocation29_spill] sm:$0xff]  ;;  %v6357_v20 = vld [vmem:[#allocation26_spill] sm:$0xff] }
 0x1e8   : > { %v4116_v1 = vpop.f32.mrf.mxu1 }
 0x1e9   : > { %3025 = vst [vmem:[%s5877_s6 + $0x80] sm:$0xff] %v2993_v5  ;;  %v2996_v57 = vadd.f32 %v5867_v29, %v2957_v36  ;;  %v2956_v16 = vadd.f32 %v2869_v10, %v2685_v24  ;;  %v2688_v61 = vadd.f32 %v4116_v1, %v2416_v22  ;;  %v2879_v21 = vpop.f32.mrf.mxu0  ;;  %v2156_v10 = vadd.f32 %v6357_v20, %v6356_v53  ;;  %v6358_v22 = vld [vmem:[#allocation11_spill] sm:$0xff]  ;;  %v6360_v24 = vld [vmem:[#allocation37_spill] sm:$0xff] }
 0x1ea   : > { %v2608_v45 = vpop.f32.mrf.mxu1  ;;  %v2422_v41 = vadd.f32 %v6358_v22, %v2154_v33  ;;  %v6359_v36 = vld [vmem:[#allocation31_spill] sm:$0xff]  ;;  %v6369_v33 = vld [vmem:[#allocation38_spill] sm:$0xff] }
 0x1eb   : > { %3028 = vst [vmem:[%s5877_s6 + $0x98] sm:$0xff] %v2996_v57  ;;  %v2995_v38 = vadd.f32 %v5867_v29, %v2956_v16  ;;  %v2959_v2 = vadd.f32 %v4166_v54, %v2688_v61  ;;  %v2687_v28 = vadd.f32 %v2608_v45, %v2415_v8  ;;  %v4169_v7 = vpop.f32.mrf.mxu0  ;;  %v2155_v54 = vadd.f32 %v6360_v24, %v6359_v36  ;;  %v6361_v8 = vld [vmem:[#allocation36_spill] sm:$0xff]  ;;  %v6362_v16 = vld [vmem:[#allocation13_spill] sm:$0xff] }
 0x1ec   : > { %v4119_v58 = vpop.f32.mrf.mxu1  ;;  %v2421_v1 = vadd.f32 %v6361_v8, %v2153_v50  ;;  %v2424_v61 = vadd.f32 %v6362_v16, %v2156_v10 }
 0x1ed   : > { %3027 = vst [vmem:[%s5877_s6 + $0x90] sm:$0xff] %v2995_v38  ;;  %v2998_v34 = vadd.f32 %v5867_v29, %v2959_v2  ;;  %v2958_v63 = vadd.f32 %v2879_v21, %v2687_v28  ;;  %v2690_v30 = vadd.f32 %v4119_v58, %v2418_v26  ;;  %v2889_v56 = vpop.f32.mrf.mxu0  ;;  %v6365_v2 = vld [vmem:[#allocation15_spill] sm:$0xff] }
 0x1ee   : > { %v2618_v43 = vpop.f32.mrf.mxu1  ;;  %v2423_v28 = vadd.f32 %v6365_v2, %v2155_v54 }
 0x1ef   : > { %3030 = vst [vmem:[%s5877_s6 + $0xa8] sm:$0xff] %v2998_v34  ;;  %v2997_v18 = vadd.f32 %v5867_v29, %v2958_v63  ;;  %v2961_v19 = vadd.f32 %v4169_v7, %v2690_v30  ;;  %v2689_v47 = vadd.f32 %v2618_v43, %v2417_v14  ;;  %v4172_v15 = vpop.f32.mrf.mxu0  ;;  %v6368_v30 = vld [vmem:[#allocation7_spill] sm:$0xff] }
 0x1f0   : > { %v4122_v42 = vpop.f32.mrf.mxu1 }
 0x1f1   : > { %3029 = vst [vmem:[%s5877_s6 + $0xa0] sm:$0xff] %v2997_v18  ;;  %v3000_v17 = vadd.f32 %v5867_v29, %v2961_v19  ;;  %v2960_v55 = vadd.f32 %v2889_v56, %v2689_v47  ;;  %v2692_v9 = vadd.f32 %v4122_v42, %v2420_v49  ;;  %v2899_v44 = vpop.f32.mrf.mxu0  ;;  %v2426_v56 = vadd.f32 %v6368_v30, %v2158_v51 }
 0x1f2   : > { %v2628_v52 = vpop.f32.mrf.mxu1  ;;  %v2425_v18 = vadd.f32 %v6369_v33, %v2157_v32 }
 0x1f3   : > { %3032 = vst [vmem:[%s5877_s6 + $0xb8] sm:$0xff] %v3000_v17  ;;  %v2999_v12 = vadd.f32 %v5867_v29, %v2960_v55  ;;  %v2963_v59 = vadd.f32 %v4172_v15, %v2692_v9  ;;  %v2691_v31 = vadd.f32 %v2628_v52, %v2419_v23  ;;  %v4175_v5 = vpop.f32.mrf.mxu0 }
 0x1f4   : > { %v4125_v6 = vpop.f32.mrf.mxu1 }
 0x1f5   : > { %3031 = vst [vmem:[%s5877_s6 + $0xb0] sm:$0xff] %v2999_v12  ;;  %v3002_v4 = vadd.f32 %v5867_v29, %v2963_v59  ;;  %v2962_v3 = vadd.f32 %v2899_v44, %v2691_v31  ;;  %v2694_v0 = vadd.f32 %v4125_v6, %v2422_v41  ;;  %v2909_v57 = vpop.f32.mrf.mxu0 }
 0x1f6   : > { %v2638_v21 = vpop.f32.mrf.mxu1 }
 0x1f7   : > { %3034 = vst [vmem:[%s5877_s6 + $0xc8] sm:$0xff] %v3002_v4  ;;  %v3001_v45 = vadd.f32 %v5867_v29, %v2962_v3  ;;  %v2965_v37 = vadd.f32 %v4175_v5, %v2694_v0  ;;  %v2693_v26 = vadd.f32 %v2638_v21, %v2421_v1  ;;  %v4178_v38 = vpop.f32.mrf.mxu0 }
 0x1f8   : > { %v4128_v7 = vpop.f32.mrf.mxu1 }
 0x1f9   : > { %3033 = vst [vmem:[%s5877_s6 + $0xc0] sm:$0xff] %v3001_v45  ;;  %v3004_v58 = vadd.f32 %v5867_v29, %v2965_v37  ;;  %v2964_v27 = vadd.f32 %v2909_v57, %v2693_v26  ;;  %v2696_v14 = vadd.f32 %v4128_v7, %v2424_v61  ;;  %v2919_v34 = vpop.f32.mrf.mxu0 }
 0x1fa   : > { %v2648_v63 = vpop.f32.mrf.mxu1 }
 0x1fb   : > { %3036 = vst [vmem:[%s5877_s6 + $0xd8] sm:$0xff] %v3004_v58  ;;  %v3003_v60 = vadd.f32 %v5867_v29, %v2964_v27  ;;  %v2967_v49 = vadd.f32 %v4178_v38, %v2696_v14  ;;  %v2695_v43 = vadd.f32 %v2648_v63, %v2423_v28  ;;  %v4181_v40 = vpop.f32.mrf.mxu0 }
 0x1fc   : > { %v4131_v13 = vpop.f32.mrf.mxu1 }
 0x1fd   : > { %3035 = vst [vmem:[%s5877_s6 + $0xd0] sm:$0xff] %v3003_v60  ;;  %v3006_v19 = vadd.f32 %v5867_v29, %v2967_v49  ;;  %v2966_v47 = vadd.f32 %v2919_v34, %v2695_v43  ;;  %v2698_v15 = vadd.f32 %v4131_v13, %v2426_v56  ;;  %v2929_v62 = vpop.f32.mrf.mxu0 }
 0x1fe   : > { %v2658_v39 = vpop.f32.mrf.mxu1 }
 0x1ff   : > { %3038 = vst [vmem:[%s5877_s6 + $0xe8] sm:$0xff] %v3006_v19  ;;  %v3005_v23 = vadd.f32 %v5867_v29, %v2966_v47  ;;  %v2969_v42 = vadd.f32 %v4181_v40, %v2698_v15  ;;  %v2697_v46 = vadd.f32 %v2658_v39, %v2425_v18 }
 0x201   : > { %3037 = vst [vmem:[%s5877_s6 + $0xe0] sm:$0xff] %v3005_v23  ;;  %v3008_v50 = vadd.f32 %v5867_v29, %v2969_v42  ;;  %v2968_v17 = vadd.f32 %v2929_v62, %v2697_v46 }
 0x203   : > { %3040 = vst [vmem:[%s5877_s6 + $0xf8] sm:$0xff] %v3008_v50  ;;  %v3007_v55 = vadd.f32 %v5867_v29, %v2968_v17 }
 0x205   : > { %3039 = vst [vmem:[%s5877_s6 + $0xf0] sm:$0xff] %v3007_v55 }
 0x206   : > { %4239 = shalt.err (!%p4236_p3)
}
 0x207   : > { %s4240_s25 = scalar_lea.hbm %s6021_s11, 4096  ;;  %s4244_s28 = scalar_lea.hbm %s6073_s3, 8192 }
 0x208   : > { %p4241_p4 = scmp.ne.s32.totalorder %s6021_s11, %s4240_s25  ;;  %p4245_p9 = scmp.lt.s32.totalorder %s6021_s11, %s6073_s3 }
 0x209   : > { %p4246_p10 = scmp.lt.s32.totalorder %s4244_s28, %s4240_s25 }
 0x20a   : > { %p4242_p7 = pnand %p4241_p4, %p4349_p5 }
 0x20b   : > { %p4247_p11 = por %p4246_p10, %p4245_p9 }
 0x20c   : > { %p4243_p8 = pneg %p4242_p7 }
 0x20e   : > { %p4248_p12 = pnand %p4247_p11, %p4243_p8 }
 0x210   : > { %4251 = shalt.err (!%p4248_p12)
}
 0x211   : > { %s4289_s4 = smov 128   ;;  %s4290_s5 = smov 8  }
 0x212   : > { %4185 = dma.vmem_to_hbm [thread:$0]  (%p4349_p5), %s6023_s8, 4096, %s6021_s11, %s6030_s16, %s4289_s4, %s4289_s4, %s4290_s5  }
 0x213 PF: > { %p4191_p13 = scmp.ge.s32.totalorder %s4286_s15, 2  ;;  %s3070_s6 = sand.u32 1, %s4274_s12  }
 0x214   : > { %s3071_s7 = scalar_lea.sflag [#allocation3], %s3070_s6 }
 0x215   : > { %p4188_p0 = pnand %p4191_p13, %p4353_p6 }
 0x217   : > { %p4189_p1 = pneg %p4188_p0 }
 0x219   : > { %4269 = dma.done.wait (%p4189_p1), %s3071_s7, 4096  }
 0x21a   : > { %4271 = vsyncadd (%p4189_p1), %s3071_s7, 4294963200  ;;  %p13_p2 = scmp.ge.s32.totalorder %s4336_s18, 4   ;;  %s6370_s12 = smov %s4278_s13 }
 0x21b   : > { %s6371_s13 = smov %s4282_s14  ;;  %s6372_s14 = smov %s4347_s21 }
 0x21c   : > { %s6373_s15 = smov %s4336_s18  ;;  %15 = sbr.rel (!%p13_p2) target bundleno = 3 (0x3), region = 75 }
 0x221   :  { %3076 = vsyncpa [#allocation3], 1 }
 0x222   :  { %3078 = vsyncpa [#allocation3 + $0x1], 1 }

</bundles_post_ra>
